<compile_context>
chip_gen: v5e
topology: v5e:2x2
jax: 0.10.0
libtpu: 0.0.40
codegen_flags: <defaults>
</compile_context>

<pallas_src>
import functools

import jax
import jax.numpy as jnp
from jax.experimental import pallas as pl
from jax.experimental.pallas import tpu as pltpu


def _round_up(x, m):
    return ((x + m - 1) // m) * m


# ----------------------------------------------------------------------------
# Pallas kernel: fused conv-as-matmul (+ optional batch stats) + activation
# ----------------------------------------------------------------------------
def _matmul_kernel(x_ref, w_ref, b_ref, *refs, activation, with_stats,
                   single_k):
    """Grid (m, n, k).  acc = x @ w (f32); epilogue emits activation'd output
    and, for BN layers, pre-bias per-tile column sums / sums-of-squares."""
    if with_stats:
        y_ref, sum_ref, sumsq_ref = refs[0], refs[1], refs[2]
        acc_refs = refs[3:]
    else:
        y_ref = refs[0]
        acc_refs = refs[1:]

    def epilogue(acc):
        if with_stats:
            # Pre-bias stats: zero-padded M rows contribute nothing, so the
            # wrapper divides by the true M.  The conv bias cancels inside
            # BN's (x - mean), so the raw (pre-bias) output is stored.
            sum_ref[...] = jnp.sum(acc, axis=0, keepdims=True)[None]
            sumsq_ref[...] = jnp.sum(acc * acc, axis=0, keepdims=True)[None]
            y_ref[...] = acc.astype(y_ref.dtype)
        else:
            y = acc + b_ref[...]
            if activation == "lrelu":
                y = jnp.maximum(y, 0.2 * y)          # one VALU op
            elif activation == "sigmoid":
                # exp on EUP; exact reciprocal (conv5 is tiny, cost is nil).
                y = pl.reciprocal(1.0 + jnp.exp(-y), approx=False)
            y_ref[...] = y.astype(y_ref.dtype)

    if single_k:
        # Whole reduction in one block: no scratch accumulator RMW at all.
        epilogue(jnp.dot(x_ref[...], w_ref[...],
                         preferred_element_type=jnp.float32))
    else:
        acc_ref, = acc_refs
        k = pl.program_id(2)

        @pl.when(k == 0)
        def _():
            acc_ref[...] = jnp.zeros_like(acc_ref)

        acc_ref[...] += jnp.dot(x_ref[...], w_ref[...],
                                preferred_element_type=jnp.float32)

        @pl.when(k == pl.num_programs(2) - 1)
        def _():
            epilogue(acc_ref[...])


# ----------------------------------------------------------------------------
# Pallas wrapper
# ----------------------------------------------------------------------------
def _vmem_est(tm, tn, tk, nk, out_bytes):
    return (2 * tm * tk * 2          # x, double-buffered bf16
            + 2 * tk * tn * 2        # w, double-buffered bf16
            + 2 * tm * tn * out_bytes
            + (tm * tn * 4 if nk > 1 else 0)   # f32 accumulator
            + 8 * tn * 4)            # bias + stat tiles (generous)


def fused_matmul(pat, wmat, bias, activation, with_stats, out_dtype):
    """act(pat @ wmat + bias) with bf16 MXU inputs, f32 accumulation, and a
    lane-dense (128-padded) output.  Optionally also returns per-M-tile
    pre-bias column sums / sums-of-squares for train-mode BatchNorm."""
    M, K = pat.shape
    Cout = wmat.shape[1]
    out_bytes = jnp.dtype(out_dtype).itemsize

    # Lane-dense output store: pad Cout to a multiple of 128.
    C_pad = _round_up(Cout, 128)
    TN = next(t for t in (512, 256, 128) if C_pad % t == 0)

    # Row tile (bf16 sublane packing -> multiple of 16).
    TM = min(512, _round_up(M, 16))
    M_pad = _round_up(M, TM)

    # K tile: prefer the whole reduction in one block (skips the accumulator
    # RMW); fall back to the largest 128-multiple divisor under the VMEM
    # budget (v7x: 64 MiB physical, 32 MiB default scoped; v5e: 16 MiB scoped).
    budget = 20 * 1024 * 1024
    if K % 128 != 0:
        TK = K                        # full-extent block is always legal
    else:
        TK = 128
        for cand in (K, 2048, 1024, 512, 256):
            if K % cand == 0 and _vmem_est(TM, TN, cand, K // cand,
                                           out_bytes) <= budget:
                TK = cand
                break
    nk = K // TK
    single_k = (nk == 1)

    # Megacore guard (v7x, 2 TCs): make sure the parallel (M, N) grid has at
    # least 2 independent tiles when possible.
    if (M_pad // TM) * (C_pad // TN) < 2 and TM >= 32 and M > TM // 2:
        TM //= 2
        M_pad = _round_up(M, TM)

    nm, nn = M_pad // TM, C_pad // TN

    # Operand prep: pat is already bf16; only pad the M tail (rare & tiny).
    pat_p = pat.astype(jnp.bfloat16)
    if M_pad != M:
        pat_p = jnp.pad(pat_p, ((0, M_pad - M), (0, 0)))
    w_p = jnp.pad(wmat.astype(jnp.bfloat16), ((0, 0), (0, C_pad - Cout)))
    b_p = jnp.pad(bias.astype(jnp.float32), (0, C_pad - Cout)).reshape(1, C_pad)

    y_shape = jax.ShapeDtypeStruct((M_pad, C_pad), out_dtype)
    y_spec = pl.BlockSpec((TM, TN), lambda i, j, k: (i, j))
    if with_stats:
        stat_shape = jax.ShapeDtypeStruct((nm, 1, C_pad), jnp.float32)
        stat_spec = pl.BlockSpec((1, 1, TN), lambda i, j, k: (i, 0, j))
        out_shape = (y_shape, stat_shape, stat_shape)
        out_specs = (y_spec, stat_spec, stat_spec)
    else:
        out_shape, out_specs = y_shape, y_spec

    kernel = functools.partial(_matmul_kernel, activation=activation,
                               with_stats=with_stats, single_k=single_k)
    scratch = [] if single_k else [pltpu.VMEM((TM, TN), jnp.float32)]
    vmem_limit = int(min(48 * 1024 * 1024,
                         max(32 * 1024 * 1024,
                             _vmem_est(TM, TN, TK, nk, out_bytes)
                             + 4 * 1024 * 1024)))

    res = pl.pallas_call(
        kernel,
        out_shape=out_shape,
        grid=(nm, nn, nk),
        in_specs=[
            pl.BlockSpec((TM, TK), lambda i, j, k: (i, k)),
            pl.BlockSpec((TK, TN), lambda i, j, k: (k, j)),
            pl.BlockSpec((1, TN), lambda i, j, k: (0, j)),
        ],
        out_specs=out_specs,
        scratch_shapes=scratch,
        compiler_params=pltpu.CompilerParams(
            dimension_semantics=("parallel", "parallel", "arbitrary"),
            vmem_limit_bytes=vmem_limit),
    )(pat_p, w_p, b_p)

    if with_stats:
        y, s, ss = res
        return y, (s, ss), C_pad
    return res, None, C_pad


# ----------------------------------------------------------------------------
# Patch extraction (wrapper-side glue, built directly in bf16)
# ----------------------------------------------------------------------------
def _patches_stride2(x):
    """4x4 / stride 2 / pad 1 conv patches via space-to-depth (4x, not 16x)."""
    N, H, W, C = x.shape
    OH, OW = H // 2, W // 2
    HP, WP = OH + 1, OW + 1
    xp = jnp.pad(x, ((0, 0), (1, 1), (1, 1), (0, 0)))
    xs = xp.reshape(N, HP, 2, WP, 2, C).transpose(0, 1, 3, 2, 4, 5)
    xs = xs.reshape(N, HP, WP, 4 * C)                  # last dim: (rh, rw, ci)
    taps = [xs[:, dh:dh + OH, dw:dw + OW, :] for dh in (0, 1) for dw in (0, 1)]
    pat = jnp.concatenate(taps, axis=-1)               # K = (dh, dw, rh, rw, ci)
    return pat.reshape(N * OH * OW, 16 * C), (N, OH, OW)


def _weights_stride2(w):
    """(Cout, Cin, 4, 4) -> (16*Cin, Cout), K order (dh, dw, rh, rw, ci)."""
    Cout, Cin = w.shape[:2]
    wr = w.reshape(Cout, Cin, 2, 2, 2, 2)              # co, ci, dh, rh, dw, rw
    return wr.transpose(2, 4, 3, 5, 1, 0).reshape(16 * Cin, Cout)


def _patches_valid(x, KH=4, KW=4):
    """Stride-1 'valid' conv patches (used only by the tiny conv5)."""
    N, H, W, C = x.shape
    OH, OW = H - KH + 1, W - KW + 1
    taps = [x[:, kh:kh + OH, kw:kw + OW, :]
            for kh in range(KH) for kw in range(KW)]
    pat = jnp.concatenate(taps, axis=-1)               # K = (kh, kw, ci)
    return pat.reshape(N * OH * OW, KH * KW * C), (N, OH, OW)


def _weights_valid(w):
    return jnp.transpose(w, (2, 3, 1, 0)).reshape(-1, w.shape[0])


# ----------------------------------------------------------------------------
# Conv blocks
# ----------------------------------------------------------------------------
def conv_block(x_nhwc, w, b, *, stride, mode, gamma=None, beta=None,
               out_dtype=jnp.bfloat16):
    Cout = w.shape[0]
    if stride == 2:
        pat, (N, OH, OW) = _patches_stride2(x_nhwc)
        wmat = _weights_stride2(w)
    else:
        pat, (N, OH, OW) = _patches_valid(x_nhwc)
        wmat = _weights_valid(w)
    M = pat.shape[0]

    if mode == "bn_lrelu":
        # Kernel writes raw (pre-bias) conv output + per-tile stats.  The BN
        # affine + LeakyReLU is applied lazily here so XLA fuses it into the
        # next layer's patch build: no separate BN-apply pass over HBM.
        y, (s, ss), _ = fused_matmul(pat, wmat, b, "none", True, jnp.bfloat16)
        total = jnp.sum(s, axis=(0, 1))[:Cout]
        totalsq = jnp.sum(ss, axis=(0, 1))[:Cout]
        mean0 = total / M                              # padded rows were zero
        var = jnp.maximum(totalsq / M - mean0 * mean0, 0.0)   # biased, as BN
        # Conv bias cancels inside (x - mean) and does not affect variance.
        scale = gamma.astype(jnp.float32) * jax.lax.rsqrt(var + 1e-5)
        shift = beta.astype(jnp.float32) - mean0 * scale
        t = y[:M, :Cout].astype(jnp.float32) * scale + shift
        out = jnp.maximum(t, 0.2 * t).astype(jnp.bfloat16)
    else:  # "lrelu" or "sigmoid": fused in the matmul epilogue
        y, _, _ = fused_matmul(pat, wmat, b, mode, False, out_dtype)
        out = y[:M, :Cout]

    return out.reshape(N, OH, OW, Cout)


# ----------------------------------------------------------------------------
# Parameters (gaussian_weights_init semantics; BN fresh: gamma=1, beta=0)
# ----------------------------------------------------------------------------
def init_params(key, in_ch, d):
    dims = [(d, in_ch), (2 * d, d), (4 * d, 2 * d), (8 * d, 4 * d), (1, 8 * d)]
    params = {}
    for i, (co, ci) in enumerate(dims, start=1):
        key, kw = jax.random.split(key)
        params[f"conv{i}_w"] = 0.02 * jax.random.normal(
            kw, (co, ci, 4, 4), dtype=jnp.float32)
        params[f"conv{i}_b"] = jnp.zeros((co,), jnp.float32)
    for i, c in zip((2, 3, 4), (2 * d, 4 * d, 8 * d)):
        params[f"bn{i}_gamma"] = jnp.ones((c,), jnp.float32)
        params[f"bn{i}_beta"] = jnp.zeros((c,), jnp.float32)
    return params


# ----------------------------------------------------------------------------
# Forward pass (matches discriminator.forward, train-mode BN batch stats)
# ----------------------------------------------------------------------------
def discriminator_forward(params, inp_nchw, label_nc11):
    N, _, H, W = inp_nchw.shape
    Cl = label_nc11.shape[1]
    label_full = jnp.broadcast_to(label_nc11, (N, Cl, H, W))   # label.expand
    x = jnp.concatenate([inp_nchw, label_full], axis=1)        # cat on channel
    x = jnp.transpose(x, (0, 2, 3, 1)).astype(jnp.bfloat16)    # NCHW -> NHWC

    x = conv_block(x, params["conv1_w"], params["conv1_b"],
                   stride=2, mode="lrelu")
    for i in (2, 3, 4):
        x = conv_block(x, params[f"conv{i}_w"], params[f"conv{i}_b"],
                       stride=2, mode="bn_lrelu",
                       gamma=params[f"bn{i}_gamma"],
                       beta=params[f"bn{i}_beta"])
    x = conv_block(x, params["conv5_w"], params["conv5_b"],
                   stride=1, mode="sigmoid", out_dtype=jnp.float32)
    return jnp.transpose(x, (0, 3, 1, 2))                      # back to NCHW


# ----------------------------------------------------------------------------
# Pure-JAX f32 reference (numerical sanity check only)
# ----------------------------------------------------------------------------
def reference_forward(params, inp, label):
    N, _, H, W = inp.shape
    Cl = label.shape[1]
    x = jnp.concatenate([inp, jnp.broadcast_to(label, (N, Cl, H, W))], axis=1)

    def conv(x, w, b, stride, pad):
        y = jax.lax.conv_general_dilated(
            x, w, window_strides=(stride, stride),
            padding=[(pad, pad), (pad, pad)],
            dimension_numbers=("NCHW", "OIHW", "NCHW"),
            precision=jax.lax.Precision.HIGHEST)
        return y + b.reshape(1, -1, 1, 1)

    def bn(x, gamma, beta):
        mean = jnp.mean(x, axis=(0, 2, 3), keepdims=True)
        var = jnp.mean((x - mean) ** 2, axis=(0, 2, 3), keepdims=True)
        return ((x - mean) * jax.lax.rsqrt(var + 1e-5)
                * gamma.reshape(1, -1, 1, 1) + beta.reshape(1, -1, 1, 1))

    def lrelu(t):
        return jnp.maximum(t, 0.2 * t)

    x = lrelu(conv(x, params["conv1_w"], params["conv1_b"], 2, 1))
    for i in (2, 3, 4):
        x = conv(x, params[f"conv{i}_w"], params[f"conv{i}_b"], 2, 1)
        x = lrelu(bn(x, params[f"bn{i}_gamma"], params[f"bn{i}_beta"]))
    x = conv(x, params["conv5_w"], params["conv5_b"], 1, 0)
    return jax.nn.sigmoid(x)


# ----------------------------------------------------------------------------
if __name__ == "__main__":
    # num_channel=1, num_classes=3 -> 4 input channels; spatial must be 64 so
    # the final 4x4 'valid' conv sees a 4x4 map; d=8 (module default is 64).
    N, num_channel, num_classes, H, W, d = 2, 1, 3, 64, 64, 8

    key = jax.random.PRNGKey(0)
    k_in, k_lab, k_par = jax.random.split(key, 3)
    inp = jax.random.normal(k_in, (N, num_channel, H, W), dtype=jnp.float32)
    label = jax.random.normal(k_lab, (N, num_classes, 1, 1), dtype=jnp.float32)
    params = init_params(k_par, num_channel + num_classes, d)

    fwd = jax.jit(discriminator_forward)
    out = jax.block_until_ready(fwd(params, inp, label))
    assert out.shape == (N, 1, 1, 1), out.shape

    ref = jax.block_until_ready(reference_forward(params, inp, label))
    max_err = float(jnp.max(jnp.abs(out.astype(jnp.float32) - ref)))
    assert max_err < 5e-2, f"max abs err vs f32 reference: {max_err}"

    print("KERNEL_OK")
</pallas_src>

<mosaic_0001>
module attributes {stable_mosaic.version = 11 : i64} {
  func.func @_matmul_kernel(%arg0: i32, %arg1: i32, %arg2: i32, %arg3: memref<512x64xbf16, #tpu.memory_space<vmem>>, %arg4: memref<64x128xbf16, #tpu.memory_space<vmem>>, %arg5: memref<1x128xf32, #tpu.memory_space<vmem>>, %arg6: memref<512x128xbf16, #tpu.memory_space<vmem>>) attributes {dimension_semantics = [#tpu.dimension_semantics<parallel>, #tpu.dimension_semantics<parallel>, #tpu.dimension_semantics<arbitrary>], iteration_bounds = array<i64: 4, 1, 1>, scalar_prefetch = 0 : i64, scratch_operands = 0 : i64, tpu.core_type = #tpu.core_type<tc>, window_params = [{transform_indices = @transform_0, window_bounds = array<i64: 512, 64>}, {transform_indices = @transform_1, window_bounds = array<i64: 64, 128>}, {transform_indices = @transform_2, window_bounds = array<i64: 1, 128>}, {transform_indices = @transform_3, window_bounds = array<i64: 512, 128>}]} {
    %c0 = arith.constant 0 : index
    %c0_0 = arith.constant 0 : index
    %0 = vector.load %arg3[%c0, %c0_0] : memref<512x64xbf16, #tpu.memory_space<vmem>>, vector<512x64xbf16>
    %c0_1 = arith.constant 0 : index
    %c0_2 = arith.constant 0 : index
    %1 = vector.load %arg4[%c0_1, %c0_2] : memref<64x128xbf16, #tpu.memory_space<vmem>>, vector<64x128xbf16>
    %cst = arith.constant dense<0.000000e+00> : vector<512x128xf32>
    %2 = tpu.matmul %0, %1, %cst {dimension_numbers = #tpu.dot_dimension_numbers<[1], [0], [0], [1], [0, 0, 1, 1], [], []>} : vector<512x64xbf16>, vector<64x128xbf16>, vector<512x128xf32> -> vector<512x128xf32>
    %c0_3 = arith.constant 0 : index
    %c0_4 = arith.constant 0 : index
    %3 = vector.load %arg5[%c0_3, %c0_4] : memref<1x128xf32, #tpu.memory_space<vmem>>, vector<1x128xf32>
    %4 = vector.broadcast %3 : vector<1x128xf32> to vector<512x128xf32>
    %5 = arith.addf %2, %4 : vector<512x128xf32>
    %cst_5 = arith.constant 2.000000e-01 : f32
    %6 = vector.broadcast %cst_5 : f32 to vector<512x128xf32>
    %7 = arith.mulf %6, %5 : vector<512x128xf32>
    %8 = arith.maximumf %5, %7 : vector<512x128xf32>
    %9 = arith.truncf %8 : vector<512x128xf32> to vector<512x128xbf16>
    %c0_6 = arith.constant 0 : index
    %c0_7 = arith.constant 0 : index
    %10 = vector.load %arg6[%c0_6, %c0_7] : memref<512x128xbf16, #tpu.memory_space<vmem>>, vector<512x128xbf16>
    tpu.vector_store %arg6[%c0_6, %c0_7], %9 {strides = array<i32>} : memref<512x128xbf16, #tpu.memory_space<vmem>>, vector<512x128xbf16>,
    return
  }
  func.func @transform_0(%arg0: i32, %arg1: i32, %arg2: i32) -> (i32, i32) {
    %c0_i32 = arith.constant 0 : i32
    return %arg0, %arg2 : i32, i32
  }
  func.func @transform_1(%arg0: i32, %arg1: i32, %arg2: i32) -> (i32, i32) {
    %c0_i32 = arith.constant 0 : i32
    return %arg2, %arg1 : i32, i32
  }
  func.func @transform_2(%arg0: i32, %arg1: i32, %arg2: i32) -> (i32, i32) {
    %c0_i32 = arith.constant 0 : i32
    %c0_i32_0 = arith.constant 0 : i32
    return %c0_i32, %arg1 : i32, i32
  }
  func.func @transform_3(%arg0: i32, %arg1: i32, %arg2: i32) -> (i32, i32) {
    %c0_i32 = arith.constant 0 : i32
    return %arg0, %arg1 : i32, i32
  }
}

module attributes {stable_mosaic.version = 11 : i64} {
  func.func @_matmul_kernel(%arg0: i32, %arg1: i32, %arg2: i32, %arg3: memref<256x128xbf16, #tpu.memory_space<vmem>>, %arg4: memref<128x128xbf16, #tpu.memory_space<vmem>>, %arg5: memref<1x128xf32, #tpu.memory_space<vmem>>, %arg6: memref<256x128xbf16, #tpu.memory_space<vmem>>, %arg7: memref<1x1x128xf32, #tpu.memory_space<vmem>>, %arg8: memref<1x1x128xf32, #tpu.memory_space<vmem>>) attributes {dimension_semantics = [#tpu.dimension_semantics<parallel>, #tpu.dimension_semantics<parallel>, #tpu.dimension_semantics<arbitrary>], iteration_bounds = array<i64: 2, 1, 1>, scalar_prefetch = 0 : i64, scratch_operands = 0 : i64, tpu.core_type = #tpu.core_type<tc>, window_params = [{transform_indices = @transform_0, window_bounds = array<i64: 256, 128>}, {transform_indices = @transform_1, window_bounds = array<i64: 128, 128>}, {transform_indices = @transform_2, window_bounds = array<i64: 1, 128>}, {transform_indices = @transform_3, window_bounds = array<i64: 256, 128>}, {transform_indices = @transform_4, window_bounds = array<i64: 1, 1, 128>}, {transform_indices = @transform_5, window_bounds = array<i64: 1, 1, 128>}]} {
    %c0 = arith.constant 0 : index
    %c0_0 = arith.constant 0 : index
    %0 = vector.load %arg3[%c0, %c0_0] : memref<256x128xbf16, #tpu.memory_space<vmem>>, vector<256x128xbf16>
    %c0_1 = arith.constant 0 : index
    %c0_2 = arith.constant 0 : index
    %1 = vector.load %arg4[%c0_1, %c0_2] : memref<128x128xbf16, #tpu.memory_space<vmem>>, vector<128x128xbf16>
    %cst = arith.constant dense<0.000000e+00> : vector<256x128xf32>
    %2 = tpu.matmul %0, %1, %cst {dimension_numbers = #tpu.dot_dimension_numbers<[1], [0], [0], [1], [0, 0, 1, 1], [], []>} : vector<256x128xbf16>, vector<128x128xbf16>, vector<256x128xf32> -> vector<256x128xf32>
    %cst_3 = arith.constant dense<0.000000e+00> : vector<128xf32>
    %3 = vector.multi_reduction <add>, %2, %cst_3 [0] : vector<256x128xf32> to vector<128xf32>
    %4 = vector.shape_cast %3 : vector<128xf32> to vector<1x128xf32>
    %5 = vector.shape_cast %4 : vector<1x128xf32> to vector<1x1x128xf32>
    %c0_4 = arith.constant 0 : index
    %c0_5 = arith.constant 0 : index
    %c0_6 = arith.constant 0 : index
    %6 = vector.load %arg7[%c0_4, %c0_5, %c0_6] : memref<1x1x128xf32, #tpu.memory_space<vmem>>, vector<1x1x128xf32>
    tpu.vector_store %arg7[%c0_4, %c0_5, %c0_6], %5 {strides = array<i32>} : memref<1x1x128xf32, #tpu.memory_space<vmem>>, vector<1x1x128xf32>,
    %7 = arith.mulf %2, %2 : vector<256x128xf32>
    %cst_7 = arith.constant dense<0.000000e+00> : vector<128xf32>
    %8 = vector.multi_reduction <add>, %7, %cst_7 [0] : vector<256x128xf32> to vector<128xf32>
    %9 = vector.shape_cast %8 : vector<128xf32> to vector<1x128xf32>
    %10 = vector.shape_cast %9 : vector<1x128xf32> to vector<1x1x128xf32>
    %c0_8 = arith.constant 0 : index
    %c0_9 = arith.constant 0 : index
    %c0_10 = arith.constant 0 : index
    %11 = vector.load %arg8[%c0_8, %c0_9, %c0_10] : memref<1x1x128xf32, #tpu.memory_space<vmem>>, vector<1x1x128xf32>
    tpu.vector_store %arg8[%c0_8, %c0_9, %c0_10], %10 {strides = array<i32>} : memref<1x1x128xf32, #tpu.memory_space<vmem>>, vector<1x1x128xf32>,
    %12 = arith.truncf %2 : vector<256x128xf32> to vector<256x128xbf16>
    %c0_11 = arith.constant 0 : index
    %c0_12 = arith.constant 0 : index
    %13 = vector.load %arg6[%c0_11, %c0_12] : memref<256x128xbf16, #tpu.memory_space<vmem>>, vector<256x128xbf16>
    tpu.vector_store %arg6[%c0_11, %c0_12], %12 {strides = array<i32>} : memref<256x128xbf16, #tpu.memory_space<vmem>>, vector<256x128xbf16>,
    return
  }
  func.func @transform_0(%arg0: i32, %arg1: i32, %arg2: i32) -> (i32, i32) {
    %c0_i32 = arith.constant 0 : i32
    return %arg0, %arg2 : i32, i32
  }
  func.func @transform_1(%arg0: i32, %arg1: i32, %arg2: i32) -> (i32, i32) {
    %c0_i32 = arith.constant 0 : i32
    return %arg2, %arg1 : i32, i32
  }
  func.func @transform_2(%arg0: i32, %arg1: i32, %arg2: i32) -> (i32, i32) {
    %c0_i32 = arith.constant 0 : i32
    %c0_i32_0 = arith.constant 0 : i32
    return %c0_i32, %arg1 : i32, i32
  }
  func.func @transform_3(%arg0: i32, %arg1: i32, %arg2: i32) -> (i32, i32) {
    %c0_i32 = arith.constant 0 : i32
    return %arg0, %arg1 : i32, i32
  }
  func.func @transform_4(%arg0: i32, %arg1: i32, %arg2: i32) -> (i32, i32, i32) {
    %c0_i32 = arith.constant 0 : i32
    %c0_i32_0 = arith.constant 0 : i32
    return %arg0, %c0_i32, %arg1 : i32, i32, i32
  }
  func.func @transform_5(%arg0: i32, %arg1: i32, %arg2: i32) -> (i32, i32, i32) {
    %c0_i32 = arith.constant 0 : i32
    %c0_i32_0 = arith.constant 0 : i32
    return %arg0, %c0_i32, %arg1 : i32, i32, i32
  }
}

module attributes {stable_mosaic.version = 11 : i64} {
  func.func @_matmul_kernel(%arg0: i32, %arg1: i32, %arg2: i32, %arg3: memref<64x256xbf16, #tpu.memory_space<vmem>>, %arg4: memref<256x128xbf16, #tpu.memory_space<vmem>>, %arg5: memref<1x128xf32, #tpu.memory_space<vmem>>, %arg6: memref<64x128xbf16, #tpu.memory_space<vmem>>, %arg7: memref<1x1x128xf32, #tpu.memory_space<vmem>>, %arg8: memref<1x1x128xf32, #tpu.memory_space<vmem>>) attributes {dimension_semantics = [#tpu.dimension_semantics<parallel>, #tpu.dimension_semantics<parallel>, #tpu.dimension_semantics<arbitrary>], iteration_bounds = array<i64: 2, 1, 1>, scalar_prefetch = 0 : i64, scratch_operands = 0 : i64, tpu.core_type = #tpu.core_type<tc>, window_params = [{transform_indices = @transform_0, window_bounds = array<i64: 64, 256>}, {transform_indices = @transform_1, window_bounds = array<i64: 256, 128>}, {transform_indices = @transform_2, window_bounds = array<i64: 1, 128>}, {transform_indices = @transform_3, window_bounds = array<i64: 64, 128>}, {transform_indices = @transform_4, window_bounds = array<i64: 1, 1, 128>}, {transform_indices = @transform_5, window_bounds = array<i64: 1, 1, 128>}]} {
    %c0 = arith.constant 0 : index
    %c0_0 = arith.constant 0 : index
    %0 = vector.load %arg3[%c0, %c0_0] : memref<64x256xbf16, #tpu.memory_space<vmem>>, vector<64x256xbf16>
    %c0_1 = arith.constant 0 : index
    %c0_2 = arith.constant 0 : index
    %1 = vector.load %arg4[%c0_1, %c0_2] : memref<256x128xbf16, #tpu.memory_space<vmem>>, vector<256x128xbf16>
    %cst = arith.constant dense<0.000000e+00> : vector<64x128xf32>
    %2 = tpu.matmul %0, %1, %cst {dimension_numbers = #tpu.dot_dimension_numbers<[1], [0], [0], [1], [0, 0, 1, 1], [], []>} : vector<64x256xbf16>, vector<256x128xbf16>, vector<64x128xf32> -> vector<64x128xf32>
    %cst_3 = arith.constant dense<0.000000e+00> : vector<128xf32>
    %3 = vector.multi_reduction <add>, %2, %cst_3 [0] : vector<64x128xf32> to vector<128xf32>
    %4 = vector.shape_cast %3 : vector<128xf32> to vector<1x128xf32>
    %5 = vector.shape_cast %4 : vector<1x128xf32> to vector<1x1x128xf32>
    %c0_4 = arith.constant 0 : index
    %c0_5 = arith.constant 0 : index
    %c0_6 = arith.constant 0 : index
    %6 = vector.load %arg7[%c0_4, %c0_5, %c0_6] : memref<1x1x128xf32, #tpu.memory_space<vmem>>, vector<1x1x128xf32>
    tpu.vector_store %arg7[%c0_4, %c0_5, %c0_6], %5 {strides = array<i32>} : memref<1x1x128xf32, #tpu.memory_space<vmem>>, vector<1x1x128xf32>,
    %7 = arith.mulf %2, %2 : vector<64x128xf32>
    %cst_7 = arith.constant dense<0.000000e+00> : vector<128xf32>
    %8 = vector.multi_reduction <add>, %7, %cst_7 [0] : vector<64x128xf32> to vector<128xf32>
    %9 = vector.shape_cast %8 : vector<128xf32> to vector<1x128xf32>
    %10 = vector.shape_cast %9 : vector<1x128xf32> to vector<1x1x128xf32>
    %c0_8 = arith.constant 0 : index
    %c0_9 = arith.constant 0 : index
    %c0_10 = arith.constant 0 : index
    %11 = vector.load %arg8[%c0_8, %c0_9, %c0_10] : memref<1x1x128xf32, #tpu.memory_space<vmem>>, vector<1x1x128xf32>
    tpu.vector_store %arg8[%c0_8, %c0_9, %c0_10], %10 {strides = array<i32>} : memref<1x1x128xf32, #tpu.memory_space<vmem>>, vector<1x1x128xf32>,
    %12 = arith.truncf %2 : vector<64x128xf32> to vector<64x128xbf16>
    %c0_11 = arith.constant 0 : index
    %c0_12 = arith.constant 0 : index
    %13 = vector.load %arg6[%c0_11, %c0_12] : memref<64x128xbf16, #tpu.memory_space<vmem>>, vector<64x128xbf16>
    tpu.vector_store %arg6[%c0_11, %c0_12], %12 {strides = array<i32>} : memref<64x128xbf16, #tpu.memory_space<vmem>>, vector<64x128xbf16>,
    return
  }
  func.func @transform_0(%arg0: i32, %arg1: i32, %arg2: i32) -> (i32, i32) {
    %c0_i32 = arith.constant 0 : i32
    return %arg0, %arg2 : i32, i32
  }
  func.func @transform_1(%arg0: i32, %arg1: i32, %arg2: i32) -> (i32, i32) {
    %c0_i32 = arith.constant 0 : i32
    return %arg2, %arg1 : i32, i32
  }
  func.func @transform_2(%arg0: i32, %arg1: i32, %arg2: i32) -> (i32, i32) {
    %c0_i32 = arith.constant 0 : i32
    %c0_i32_0 = arith.constant 0 : i32
    return %c0_i32, %arg1 : i32, i32
  }
  func.func @transform_3(%arg0: i32, %arg1: i32, %arg2: i32) -> (i32, i32) {
    %c0_i32 = arith.constant 0 : i32
    return %arg0, %arg1 : i32, i32
  }
  func.func @transform_4(%arg0: i32, %arg1: i32, %arg2: i32) -> (i32, i32, i32) {
    %c0_i32 = arith.constant 0 : i32
    %c0_i32_0 = arith.constant 0 : i32
    return %arg0, %c0_i32, %arg1 : i32, i32, i32
  }
  func.func @transform_5(%arg0: i32, %arg1: i32, %arg2: i32) -> (i32, i32, i32) {
    %c0_i32 = arith.constant 0 : i32
    %c0_i32_0 = arith.constant 0 : i32
    return %arg0, %c0_i32, %arg1 : i32, i32, i32
  }
}

module attributes {stable_mosaic.version = 11 : i64} {
  func.func @_matmul_kernel(%arg0: i32, %arg1: i32, %arg2: i32, %arg3: memref<16x512xbf16, #tpu.memory_space<vmem>>, %arg4: memref<512x128xbf16, #tpu.memory_space<vmem>>, %arg5: memref<1x128xf32, #tpu.memory_space<vmem>>, %arg6: memref<16x128xbf16, #tpu.memory_space<vmem>>, %arg7: memref<1x1x128xf32, #tpu.memory_space<vmem>>, %arg8: memref<1x1x128xf32, #tpu.memory_space<vmem>>) attributes {dimension_semantics = [#tpu.dimension_semantics<parallel>, #tpu.dimension_semantics<parallel>, #tpu.dimension_semantics<arbitrary>], iteration_bounds = array<i64: 2, 1, 1>, scalar_prefetch = 0 : i64, scratch_operands = 0 : i64, tpu.core_type = #tpu.core_type<tc>, window_params = [{transform_indices = @transform_0, window_bounds = array<i64: 16, 512>}, {transform_indices = @transform_1, window_bounds = array<i64: 512, 128>}, {transform_indices = @transform_2, window_bounds = array<i64: 1, 128>}, {transform_indices = @transform_3, window_bounds = array<i64: 16, 128>}, {transform_indices = @transform_4, window_bounds = array<i64: 1, 1, 128>}, {transform_indices = @transform_5, window_bounds = array<i64: 1, 1, 128>}]} {
    %c0 = arith.constant 0 : index
    %c0_0 = arith.constant 0 : index
    %0 = vector.load %arg3[%c0, %c0_0] : memref<16x512xbf16, #tpu.memory_space<vmem>>, vector<16x512xbf16>
    %c0_1 = arith.constant 0 : index
    %c0_2 = arith.constant 0 : index
    %1 = vector.load %arg4[%c0_1, %c0_2] : memref<512x128xbf16, #tpu.memory_space<vmem>>, vector<512x128xbf16>
    %cst = arith.constant dense<0.000000e+00> : vector<16x128xf32>
    %2 = tpu.matmul %0, %1, %cst {dimension_numbers = #tpu.dot_dimension_numbers<[1], [0], [0], [1], [0, 0, 1, 1], [], []>} : vector<16x512xbf16>, vector<512x128xbf16>, vector<16x128xf32> -> vector<16x128xf32>
    %cst_3 = arith.constant dense<0.000000e+00> : vector<128xf32>
    %3 = vector.multi_reduction <add>, %2, %cst_3 [0] : vector<16x128xf32> to vector<128xf32>
    %4 = vector.shape_cast %3 : vector<128xf32> to vector<1x128xf32>
    %5 = vector.shape_cast %4 : vector<1x128xf32> to vector<1x1x128xf32>
    %c0_4 = arith.constant 0 : index
    %c0_5 = arith.constant 0 : index
    %c0_6 = arith.constant 0 : index
    %6 = vector.load %arg7[%c0_4, %c0_5, %c0_6] : memref<1x1x128xf32, #tpu.memory_space<vmem>>, vector<1x1x128xf32>
    tpu.vector_store %arg7[%c0_4, %c0_5, %c0_6], %5 {strides = array<i32>} : memref<1x1x128xf32, #tpu.memory_space<vmem>>, vector<1x1x128xf32>,
    %7 = arith.mulf %2, %2 : vector<16x128xf32>
    %cst_7 = arith.constant dense<0.000000e+00> : vector<128xf32>
    %8 = vector.multi_reduction <add>, %7, %cst_7 [0] : vector<16x128xf32> to vector<128xf32>
    %9 = vector.shape_cast %8 : vector<128xf32> to vector<1x128xf32>
    %10 = vector.shape_cast %9 : vector<1x128xf32> to vector<1x1x128xf32>
    %c0_8 = arith.constant 0 : index
    %c0_9 = arith.constant 0 : index
    %c0_10 = arith.constant 0 : index
    %11 = vector.load %arg8[%c0_8, %c0_9, %c0_10] : memref<1x1x128xf32, #tpu.memory_space<vmem>>, vector<1x1x128xf32>
    tpu.vector_store %arg8[%c0_8, %c0_9, %c0_10], %10 {strides = array<i32>} : memref<1x1x128xf32, #tpu.memory_space<vmem>>, vector<1x1x128xf32>,
    %12 = arith.truncf %2 : vector<16x128xf32> to vector<16x128xbf16>
    %c0_11 = arith.constant 0 : index
    %c0_12 = arith.constant 0 : index
    %13 = vector.load %arg6[%c0_11, %c0_12] : memref<16x128xbf16, #tpu.memory_space<vmem>>, vector<16x128xbf16>
    tpu.vector_store %arg6[%c0_11, %c0_12], %12 {strides = array<i32>} : memref<16x128xbf16, #tpu.memory_space<vmem>>, vector<16x128xbf16>,
    return
  }
  func.func @transform_0(%arg0: i32, %arg1: i32, %arg2: i32) -> (i32, i32) {
    %c0_i32 = arith.constant 0 : i32
    return %arg0, %arg2 : i32, i32
  }
  func.func @transform_1(%arg0: i32, %arg1: i32, %arg2: i32) -> (i32, i32) {
    %c0_i32 = arith.constant 0 : i32
    return %arg2, %arg1 : i32, i32
  }
  func.func @transform_2(%arg0: i32, %arg1: i32, %arg2: i32) -> (i32, i32) {
    %c0_i32 = arith.constant 0 : i32
    %c0_i32_0 = arith.constant 0 : i32
    return %c0_i32, %arg1 : i32, i32
  }
  func.func @transform_3(%arg0: i32, %arg1: i32, %arg2: i32) -> (i32, i32) {
    %c0_i32 = arith.constant 0 : i32
    return %arg0, %arg1 : i32, i32
  }
  func.func @transform_4(%arg0: i32, %arg1: i32, %arg2: i32) -> (i32, i32, i32) {
    %c0_i32 = arith.constant 0 : i32
    %c0_i32_0 = arith.constant 0 : i32
    return %arg0, %c0_i32, %arg1 : i32, i32, i32
  }
  func.func @transform_5(%arg0: i32, %arg1: i32, %arg2: i32) -> (i32, i32, i32) {
    %c0_i32 = arith.constant 0 : i32
    %c0_i32_0 = arith.constant 0 : i32
    return %arg0, %c0_i32, %arg1 : i32, i32, i32
  }
}

module attributes {stable_mosaic.version = 11 : i64} {
  func.func @_matmul_kernel(%arg0: i32, %arg1: i32, %arg2: i32, %arg3: memref<16x1024xbf16, #tpu.memory_space<vmem>>, %arg4: memref<1024x128xbf16, #tpu.memory_space<vmem>>, %arg5: memref<1x128xf32, #tpu.memory_space<vmem>>, %arg6: memref<16x128xf32, #tpu.memory_space<vmem>>) attributes {dimension_semantics = [#tpu.dimension_semantics<parallel>, #tpu.dimension_semantics<parallel>, #tpu.dimension_semantics<arbitrary>], iteration_bounds = array<i64: 1, 1, 1>, scalar_prefetch = 0 : i64, scratch_operands = 0 : i64, tpu.core_type = #tpu.core_type<tc>, window_params = [{transform_indices = @transform_0, window_bounds = array<i64: 16, 1024>}, {transform_indices = @transform_1, window_bounds = array<i64: 1024, 128>}, {transform_indices = @transform_2, window_bounds = array<i64: 1, 128>}, {transform_indices = @transform_3, window_bounds = array<i64: 16, 128>}]} {
    %c0 = arith.constant 0 : index
    %c0_0 = arith.constant 0 : index
    %0 = vector.load %arg3[%c0, %c0_0] : memref<16x1024xbf16, #tpu.memory_space<vmem>>, vector<16x1024xbf16>
    %c0_1 = arith.constant 0 : index
    %c0_2 = arith.constant 0 : index
    %1 = vector.load %arg4[%c0_1, %c0_2] : memref<1024x128xbf16, #tpu.memory_space<vmem>>, vector<1024x128xbf16>
    %cst = arith.constant dense<0.000000e+00> : vector<16x128xf32>
    %2 = tpu.matmul %0, %1, %cst {dimension_numbers = #tpu.dot_dimension_numbers<[1], [0], [0], [1], [0, 0, 1, 1], [], []>} : vector<16x1024xbf16>, vector<1024x128xbf16>, vector<16x128xf32> -> vector<16x128xf32>
    %c0_3 = arith.constant 0 : index
    %c0_4 = arith.constant 0 : index
    %3 = vector.load %arg5[%c0_3, %c0_4] : memref<1x128xf32, #tpu.memory_space<vmem>>, vector<1x128xf32>
    %4 = vector.broadcast %3 : vector<1x128xf32> to vector<16x128xf32>
    %5 = arith.addf %2, %4 : vector<16x128xf32>
    %cst_5 = arith.constant 0.000000e+00 : f32
    %6 = vector.broadcast %cst_5 : f32 to vector<16x128xf32>
    %7 = arith.subf %6, %5 : vector<16x128xf32>
    %8 = math.exp %7 : vector<16x128xf32>
    %cst_6 = arith.constant 1.000000e+00 : f32
    %9 = vector.broadcast %cst_6 : f32 to vector<16x128xf32>
    %10 = arith.addf %9, %8 : vector<16x128xf32>
    %11 = tpu.reciprocal %10 : vector<16x128xf32> -> vector<16x128xf32>
    %c0_7 = arith.constant 0 : index
    %c0_8 = arith.constant 0 : index
    %12 = vector.load %arg6[%c0_7, %c0_8] : memref<16x128xf32, #tpu.memory_space<vmem>>, vector<16x128xf32>
    tpu.vector_store %arg6[%c0_7, %c0_8], %11 {strides = array<i32>} : memref<16x128xf32, #tpu.memory_space<vmem>>, vector<16x128xf32>,
    return
  }
  func.func @transform_0(%arg0: i32, %arg1: i32, %arg2: i32) -> (i32, i32) {
    %c0_i32 = arith.constant 0 : i32
    return %arg0, %arg2 : i32, i32
  }
  func.func @transform_1(%arg0: i32, %arg1: i32, %arg2: i32) -> (i32, i32) {
    %c0_i32 = arith.constant 0 : i32
    return %arg2, %arg1 : i32, i32
  }
  func.func @transform_2(%arg0: i32, %arg1: i32, %arg2: i32) -> (i32, i32) {
    %c0_i32 = arith.constant 0 : i32
    %c0_i32_0 = arith.constant 0 : i32
    return %c0_i32, %arg1 : i32, i32
  }
  func.func @transform_3(%arg0: i32, %arg1: i32, %arg2: i32) -> (i32, i32) {
    %c0_i32 = arith.constant 0 : i32
    return %arg0, %arg1 : i32, i32
  }
}

</mosaic_0001>

<bundles_post_ra>
// kernel: discriminator_forward.5
= control target key start
LH: loop header
LB: loop body
LE: loop exit
PB: predicated region body
PF: predicated region fallthrough
CT: control target
= control target key end

     0   :  { %s1650_s12 = smov 0   ;;  %s1652_s13 = smov 0   ;;  %s1871_s0 = inlined_call_operand.vmem [shape: bf16[2048,64], index: 0, kind: input, shape index: {}]   ;;  %s1872_s1 = inlined_call_operand.vmem [shape: bf16[64,128], index: 1, kind: input, shape index: {}]   ;;  %s1873_s2 = inlined_call_operand.vmem [shape: f32[1,128], index: 2, kind: input, shape index: {}]   ;;  %s1874_s3 = inlined_call_operand.vmem [shape: bf16[2048,128], index: 3, kind: output, shape index: {}]  }
   0x1   :  { %s1654_s14 = smov 0  }
   0x2 LB: > { %s32_s15 = sadd.s32 1, %s1624_s13  ;;  %p1159_p0 = scmp.ge.s32.totalorder %s1628_s14, 1  ;;  %s1628_s14 = sphi %s1654_s14, %s13_s14   ;;  %s1624_s13 = sphi %s1652_s13, %s1876_s13   ;;  %s1620_s12 = sphi %s1650_s12, %s1875_s12  }
   0x3   : > { %p34_p1 = scmp.ge.s32.totalorder %s32_s15, 4  ;;  %p188_p2 = scmp.lt.s32.totalorder %s1628_s14, 5 }
   0x5   : > { %s1878_s15 = smov (%p34_p1, %s32_s15), 0  ;;  %p189_p3 = pnand %p1159_p0, %p188_p2 }
   0x6   : > { %s1160_s18 = sshll.u32 (!%p189_p3), %s1620_s12, 6 }
   0x7   : > { %192 = sbr.rel (%p189_p3) target bundleno = 291 (0x123), region = 32  ;;  %p230_p4 = scmp.lt.s32.totalorder (!%p189_p3), %s1160_s18, 255 }
   0xc   : > { %v1377_v0 = vld [vmem:[%s1872_s1 + $0x18] sm:$0xff]  ;;  %v1376_v1 = vld [vmem:[%s1872_s1 + $0x10] sm:$0xff]  ;;  %s1880_s18 = smov (!%p230_p4, %s1160_s18), 255  ;;  %v1375_v2 = vld [vmem:[%s1872_s1 + $0x8] sm:$0xff]  ;;  %vm520_vm0 = vcmask 523264  }
   0xd   : > { %621 = vmatpush.bf16.msra.mxu0 %v1377_v0  ;;  %1569 = vmatpush.bf16.msra.mxu1 %v1377_v0  ;;  %s1161_s23 = sshll.u32 %s1880_s18, 2  ;;  %v1374_v3 = vld [vmem:[%s1872_s1] sm:$0xff] }
   0xe   : > { %1570 = vmatpush.bf16.msra.mxu2 %v1377_v0  ;;  %1571 = vmatpush.bf16.msra.mxu3 %v1377_v0  ;;  %s1688_s28 = scalar_lea.vmem %s1871_s0, %s1161_s23  ;;  %v1757_v38 = vld [vmem:[%s1873_s2] ss:$0 sm:$0xff]  ;;  %s1770_s6 = scalar_lea.vmem %s1874_s3, %s1161_s23 }
   0xf   : > { %v1342_v4 = vld [vmem:[%s1688_s28] sm:$0xff]  ;;  %v1343_v8 = vld [vmem:[%s1688_s28 + $0x8] sm:$0xff]  ;;  %v1344_v12 = vld [vmem:[%s1688_s28 + $0x10] sm:$0xff] }
  0x10   : > { %v1350_v5 = vld [vmem:[%s1688_s28 + $0x40] sm:$0xff]  ;;  %v1351_v9 = vld [vmem:[%s1688_s28 + $0x48] sm:$0xff]  ;;  %v1352_v13 = vld [vmem:[%s1688_s28 + $0x50] sm:$0xff] }
  0x11   : > { %622 = vmatpush.bf16.msra.mxu0 %v1376_v1  ;;  %1572 = vmatpush.bf16.msra.mxu1 %v1376_v1  ;;  %v1358_v6 = vld [vmem:[%s1688_s28 + $0x80] sm:$0xff]  ;;  %v1359_v10 = vld [vmem:[%s1688_s28 + $0x88] sm:$0xff]  ;;  %v1360_v14 = vld [vmem:[%s1688_s28 + $0x90] sm:$0xff] }
  0x12   : > { %1573 = vmatpush.bf16.msra.mxu2 %v1376_v1  ;;  %1574 = vmatpush.bf16.msra.mxu3 %v1376_v1  ;;  %v1366_v7 = vld [vmem:[%s1688_s28 + $0xc0] sm:$0xff]  ;;  %v1367_v11 = vld [vmem:[%s1688_s28 + $0xc8] sm:$0xff]  ;;  %v1368_v15 = vld [vmem:[%s1688_s28 + $0xd0] sm:$0xff] }
  0x13   : > { %v1345_v16 = vld [vmem:[%s1688_s28 + $0x18] sm:$0xff]  ;;  %v1346_v20 = vld [vmem:[%s1688_s28 + $0x20] sm:$0xff]  ;;  %v1347_v24 = vld [vmem:[%s1688_s28 + $0x28] sm:$0xff] }
  0x14   : > { %v1353_v17 = vld [vmem:[%s1688_s28 + $0x58] sm:$0xff]  ;;  %v1354_v21 = vld [vmem:[%s1688_s28 + $0x60] sm:$0xff]  ;;  %v1355_v25 = vld [vmem:[%s1688_s28 + $0x68] sm:$0xff] }
  0x15   : > { %623 = vmatpush.bf16.msra.mxu0 %v1375_v2  ;;  %1575 = vmatpush.bf16.msra.mxu1 %v1375_v2  ;;  %v1361_v18 = vld [vmem:[%s1688_s28 + $0x98] sm:$0xff]  ;;  %v1362_v22 = vld [vmem:[%s1688_s28 + $0xa0] sm:$0xff]  ;;  %v1363_v26 = vld [vmem:[%s1688_s28 + $0xa8] sm:$0xff] }
  0x16   : > { %1576 = vmatpush.bf16.msra.mxu2 %v1375_v2  ;;  %1577 = vmatpush.bf16.msra.mxu3 %v1375_v2  ;;  %v1369_v19 = vld [vmem:[%s1688_s28 + $0xd8] sm:$0xff]  ;;  %v1370_v23 = vld [vmem:[%s1688_s28 + $0xe0] sm:$0xff]  ;;  %v1371_v27 = vld [vmem:[%s1688_s28 + $0xe8] sm:$0xff] }
  0x17   : > { %v1348_v28 = vld [vmem:[%s1688_s28 + $0x30] sm:$0xff]  ;;  %v1349_v32 = vld [vmem:[%s1688_s28 + $0x38] sm:$0xff] }
  0x18   : > { %v1356_v29 = vld [vmem:[%s1688_s28 + $0x70] sm:$0xff]  ;;  %v1357_v33 = vld [vmem:[%s1688_s28 + $0x78] sm:$0xff] }
  0x19   : > { %624 = vmatpush.bf16.msra.mxu0 %v1374_v3  ;;  %1578 = vmatpush.bf16.msra.mxu1 %v1374_v3  ;;  %v1364_v30 = vld [vmem:[%s1688_s28 + $0xb0] sm:$0xff]  ;;  %v1365_v34 = vld [vmem:[%s1688_s28 + $0xb8] sm:$0xff] }
  0x1a   : > { %1579 = vmatpush.bf16.msra.mxu2 %v1374_v3  ;;  %1580 = vmatpush.bf16.msra.mxu3 %v1374_v3  ;;  %v1372_v31 = vld [vmem:[%s1688_s28 + $0xf0] sm:$0xff]  ;;  %v1373_v35 = vld [vmem:[%s1688_s28 + $0xf8] sm:$0xff] }
  0x1c   : > { %1308 = vmatmul.msk.bf16.vlgmr.msra.gmra.mxu0 %vm520_vm0, %v1342_v4  ;;  %1316 = vmatmul.msk.bf16.vlgmr.msra.gmra.mxu1 %vm520_vm0, %v1350_v5 }
  0x1d   : > { %1324 = vmatmul.msk.bf16.vlgmr.msra.gmra.mxu2 %vm520_vm0, %v1358_v6  ;;  %1332 = vmatmul.msk.bf16.vlgmr.msra.gmra.mxu3 %vm520_vm0, %v1366_v7 }
  0x2c   : > { %1309 = vmatmul.msk.bf16.gmra.mxu0 %vm520_vm0, %v1343_v8  ;;  %1317 = vmatmul.msk.bf16.gmra.mxu1 %vm520_vm0, %v1351_v9 }
  0x2d   : > { %1325 = vmatmul.msk.bf16.gmra.mxu2 %vm520_vm0, %v1359_v10  ;;  %1333 = vmatmul.msk.bf16.gmra.mxu3 %vm520_vm0, %v1367_v11 }
  0x3c   : > { %1310 = vmatmul.msk.bf16.gmra.mxu0 %vm520_vm0, %v1344_v12  ;;  %1318 = vmatmul.msk.bf16.gmra.mxu1 %vm520_vm0, %v1352_v13 }
  0x3d   : > { %1326 = vmatmul.msk.bf16.gmra.mxu2 %vm520_vm0, %v1360_v14  ;;  %1334 = vmatmul.msk.bf16.gmra.mxu3 %vm520_vm0, %v1368_v15 }
  0x4c   : > { %1311 = vmatmul.msk.bf16.gmra.mxu0 %vm520_vm0, %v1345_v16  ;;  %1319 = vmatmul.msk.bf16.gmra.mxu1 %vm520_vm0, %v1353_v17 }
  0x4d   : > { %1327 = vmatmul.msk.bf16.gmra.mxu2 %vm520_vm0, %v1361_v18  ;;  %1335 = vmatmul.msk.bf16.gmra.mxu3 %vm520_vm0, %v1369_v19 }
  0x5c   : > { %1312 = vmatmul.msk.bf16.gmra.mxu0 %vm520_vm0, %v1346_v20  ;;  %1320 = vmatmul.msk.bf16.gmra.mxu1 %vm520_vm0, %v1354_v21 }
  0x5d   : > { %1328 = vmatmul.msk.bf16.gmra.mxu2 %vm520_vm0, %v1362_v22  ;;  %1336 = vmatmul.msk.bf16.gmra.mxu3 %vm520_vm0, %v1370_v23 }
  0x6c   : > { %1313 = vmatmul.msk.bf16.gmra.mxu0 %vm520_vm0, %v1347_v24  ;;  %1321 = vmatmul.msk.bf16.gmra.mxu1 %vm520_vm0, %v1355_v25 }
  0x6d   : > { %1329 = vmatmul.msk.bf16.gmra.mxu2 %vm520_vm0, %v1363_v26  ;;  %1337 = vmatmul.msk.bf16.gmra.mxu3 %vm520_vm0, %v1371_v27 }
  0x7c   : > { %1314 = vmatmul.msk.bf16.gmra.mxu0 %vm520_vm0, %v1348_v28  ;;  %1322 = vmatmul.msk.bf16.gmra.mxu1 %vm520_vm0, %v1356_v29 }
  0x7d   : > { %1330 = vmatmul.msk.bf16.gmra.mxu2 %vm520_vm0, %v1364_v30  ;;  %1338 = vmatmul.msk.bf16.gmra.mxu3 %vm520_vm0, %v1372_v31 }
  0x8c   : > { %1315 = vmatmul.msk.bf16.gmra.mxu0 %vm520_vm0, %v1349_v32  ;;  %1323 = vmatmul.msk.bf16.gmra.mxu1 %vm520_vm0, %v1357_v33 }
  0x8d   : > { %1331 = vmatmul.msk.bf16.gmra.mxu2 %vm520_vm0, %v1365_v34  ;;  %1339 = vmatmul.msk.bf16.gmra.mxu3 %vm520_vm0, %v1373_v35 }
  0x99   : > { %v626_v36 = vpop.f32.mrf.mxu0  ;;  %v666_v37 = vpop.f32.mrf.mxu1 }
  0x9a   : > { %v627_v39 = vadd.f32 %v1757_v38, %v626_v36  ;;  %v667_v40 = vadd.f32 %v1757_v38, %v666_v37 }
  0x9c   : > { %v786_v45 = vmul.f32 0.2, %v627_v39  ;;  %v802_v46 = vmul.f32 0.2, %v667_v40 }
  0x9e   : > { %v850_v53 = vmax.f32 %v627_v39, %v786_v45  ;;  %v866_v54 = vmax.f32 %v667_v40, %v802_v46 }
  0xa0   : > { %v706_v41 = vpop.f32.mrf.mxu2  ;;  %v746_v42 = vpop.f32.mrf.mxu3 }
  0xa1   : > { %v628_v43 = vpop.f32.mrf.mxu0  ;;  %v668_v44 = vpop.f32.mrf.mxu1  ;;  %v707_v51 = vadd.f32 %v1757_v38, %v706_v41  ;;  %v747_v52 = vadd.f32 %v1757_v38, %v746_v42 }
  0xa2   : > { %v629_v47 = vadd.f32 %v1757_v38, %v628_v43  ;;  %v669_v48 = vadd.f32 %v1757_v38, %v668_v44 }
  0xa3   : > { %v818_v61 = vmul.f32 0.2, %v707_v51  ;;  %v834_v62 = vmul.f32 0.2, %v747_v52 }
  0xa4   : > { %v787_v49 = vmul.f32 0.2, %v629_v47  ;;  %v803_v50 = vmul.f32 0.2, %v669_v48 }
  0xa5   : > { %v882_v5 = vmax.f32 %v707_v51, %v818_v61  ;;  %v898_v6 = vmax.f32 %v747_v52, %v834_v62 }
  0xa6   : > { %v851_v55 = vmax.f32 %v629_v47, %v787_v49  ;;  %v867_v56 = vmax.f32 %v669_v48, %v803_v50 }
  0xa8   : > { %v1381_v57 = vpack.c.bf16 %v851_v55, %v850_v53  ;;  %v1421_v58 = vpack.c.bf16 %v867_v56, %v866_v54  ;;  %v708_v59 = vpop.f32.mrf.mxu2  ;;  %v748_v60 = vpop.f32.mrf.mxu3 }
  0xa9   : > { %v709_v63 = vadd.f32 %v1757_v38, %v708_v59  ;;  %v749_v0 = vadd.f32 %v1757_v38, %v748_v60  ;;  %v631_v1 = vpop.f32.mrf.mxu0  ;;  %v671_v2 = vpop.f32.mrf.mxu1 }
  0xaa   : > { %1382 = vst [vmem:[%s1770_s6] sm:$0xff] %v1381_v57   ;;  %v632_v9 = vadd.f32 %v1757_v38, %v631_v1  ;;  %v672_v10 = vadd.f32 %v1757_v38, %v671_v2 }
  0xab   : > { %1545 = vst [vmem:[%s1770_s6 + $0x40] sm:$0xff] %v1421_v58   ;;  %v819_v3 = vmul.f32 0.2, %v709_v63  ;;  %v835_v4 = vmul.f32 0.2, %v749_v0 }
  0xac   : > { %v788_v17 = vmul.f32 0.2, %v632_v9  ;;  %v804_v18 = vmul.f32 0.2, %v672_v10 }
  0xad   : > { %v883_v7 = vmax.f32 %v709_v63, %v819_v3  ;;  %v899_v8 = vmax.f32 %v749_v0, %v835_v4 }
  0xae   : > { %v852_v25 = vmax.f32 %v632_v9, %v788_v17  ;;  %v868_v26 = vmax.f32 %v672_v10, %v804_v18 }
  0xaf   : > { %v1461_v11 = vpack.c.bf16 %v883_v7, %v882_v5  ;;  %v1501_v12 = vpack.c.bf16 %v899_v8, %v898_v6 }
  0xb0   : > { %v711_v13 = vpop.f32.mrf.mxu2  ;;  %v751_v14 = vpop.f32.mrf.mxu3 }
  0xb1   : > { %1553 = vst [vmem:[%s1770_s6 + $0x80] sm:$0xff] %v1461_v11   ;;  %v633_v15 = vpop.f32.mrf.mxu0  ;;  %v673_v16 = vpop.f32.mrf.mxu1  ;;  %v712_v23 = vadd.f32 %v1757_v38, %v711_v13  ;;  %v752_v24 = vadd.f32 %v1757_v38, %v751_v14 }
  0xb2   : > { %1561 = vst [vmem:[%s1770_s6 + $0xc0] sm:$0xff] %v1501_v12   ;;  %v634_v19 = vadd.f32 %v1757_v38, %v633_v15  ;;  %v674_v20 = vadd.f32 %v1757_v38, %v673_v16 }
  0xb3   : > { %v820_v33 = vmul.f32 0.2, %v712_v23  ;;  %v836_v34 = vmul.f32 0.2, %v752_v24 }
  0xb4   : > { %v789_v21 = vmul.f32 0.2, %v634_v19  ;;  %v805_v22 = vmul.f32 0.2, %v674_v20 }
  0xb5   : > { %v884_v42 = vmax.f32 %v712_v23, %v820_v33  ;;  %v900_v43 = vmax.f32 %v752_v24, %v836_v34 }
  0xb6   : > { %v853_v27 = vmax.f32 %v634_v19, %v789_v21  ;;  %v869_v28 = vmax.f32 %v674_v20, %v805_v22 }
  0xb8   : > { %v1386_v29 = vpack.c.bf16 %v853_v27, %v852_v25  ;;  %v1426_v30 = vpack.c.bf16 %v869_v28, %v868_v26  ;;  %v713_v31 = vpop.f32.mrf.mxu2  ;;  %v753_v32 = vpop.f32.mrf.mxu3 }
  0xb9   : > { %v714_v35 = vadd.f32 %v1757_v38, %v713_v31  ;;  %v754_v36 = vadd.f32 %v1757_v38, %v753_v32  ;;  %v636_v37 = vpop.f32.mrf.mxu0  ;;  %v676_v39 = vpop.f32.mrf.mxu1 }
  0xba   : > { %1538 = vst [vmem:[%s1770_s6 + $0x8] sm:$0xff] %v1386_v29   ;;  %v637_v46 = vadd.f32 %v1757_v38, %v636_v37  ;;  %v677_v47 = vadd.f32 %v1757_v38, %v676_v39 }
  0xbb   : > { %1546 = vst [vmem:[%s1770_s6 + $0x48] sm:$0xff] %v1426_v30   ;;  %v821_v40 = vmul.f32 0.2, %v714_v35  ;;  %v837_v41 = vmul.f32 0.2, %v754_v36 }
  0xbc   : > { %v790_v54 = vmul.f32 0.2, %v637_v46  ;;  %v806_v55 = vmul.f32 0.2, %v677_v47 }
  0xbd   : > { %v885_v44 = vmax.f32 %v714_v35, %v821_v40  ;;  %v901_v45 = vmax.f32 %v754_v36, %v837_v41 }
  0xbe   : > { %v854_v62 = vmax.f32 %v637_v46, %v790_v54  ;;  %v870_v63 = vmax.f32 %v677_v47, %v806_v55 }
  0xbf   : > { %v1466_v48 = vpack.c.bf16 %v885_v44, %v884_v42  ;;  %v1506_v49 = vpack.c.bf16 %v901_v45, %v900_v43 }
  0xc0   : > { %v716_v50 = vpop.f32.mrf.mxu2  ;;  %v756_v51 = vpop.f32.mrf.mxu3 }
  0xc1   : > { %1554 = vst [vmem:[%s1770_s6 + $0x88] sm:$0xff] %v1466_v48   ;;  %v638_v52 = vpop.f32.mrf.mxu0  ;;  %v678_v53 = vpop.f32.mrf.mxu1  ;;  %v717_v60 = vadd.f32 %v1757_v38, %v716_v50  ;;  %v757_v61 = vadd.f32 %v1757_v38, %v756_v51 }
  0xc2   : > { %1562 = vst [vmem:[%s1770_s6 + $0xc8] sm:$0xff] %v1506_v49   ;;  %v639_v56 = vadd.f32 %v1757_v38, %v638_v52  ;;  %v679_v57 = vadd.f32 %v1757_v38, %v678_v53 }
  0xc3   : > { %v822_v6 = vmul.f32 0.2, %v717_v60  ;;  %v838_v7 = vmul.f32 0.2, %v757_v61 }
  0xc4   : > { %v791_v58 = vmul.f32 0.2, %v639_v56  ;;  %v807_v59 = vmul.f32 0.2, %v679_v57 }
  0xc5   : > { %v886_v14 = vmax.f32 %v717_v60, %v822_v6  ;;  %v902_v15 = vmax.f32 %v757_v61, %v838_v7 }
  0xc6   : > { %v855_v0 = vmax.f32 %v639_v56, %v791_v58  ;;  %v871_v1 = vmax.f32 %v679_v57, %v807_v59 }
  0xc8   : > { %v1391_v2 = vpack.c.bf16 %v855_v0, %v854_v62  ;;  %v1431_v3 = vpack.c.bf16 %v871_v1, %v870_v63  ;;  %v718_v4 = vpop.f32.mrf.mxu2  ;;  %v758_v5 = vpop.f32.mrf.mxu3 }
  0xc9   : > { %v719_v8 = vadd.f32 %v1757_v38, %v718_v4  ;;  %v759_v9 = vadd.f32 %v1757_v38, %v758_v5  ;;  %v641_v10 = vpop.f32.mrf.mxu0  ;;  %v681_v11 = vpop.f32.mrf.mxu1 }
  0xca   : > { %1539 = vst [vmem:[%s1770_s6 + $0x10] sm:$0xff] %v1391_v2   ;;  %v642_v18 = vadd.f32 %v1757_v38, %v641_v10  ;;  %v682_v19 = vadd.f32 %v1757_v38, %v681_v11 }
  0xcb   : > { %1547 = vst [vmem:[%s1770_s6 + $0x50] sm:$0xff] %v1431_v3   ;;  %v823_v12 = vmul.f32 0.2, %v719_v8  ;;  %v839_v13 = vmul.f32 0.2, %v759_v9 }
  0xcc   : > { %v792_v26 = vmul.f32 0.2, %v642_v18  ;;  %v808_v27 = vmul.f32 0.2, %v682_v19 }
  0xcd   : > { %v887_v16 = vmax.f32 %v719_v8, %v823_v12  ;;  %v903_v17 = vmax.f32 %v759_v9, %v839_v13 }
  0xce   : > { %v856_v34 = vmax.f32 %v642_v18, %v792_v26  ;;  %v872_v35 = vmax.f32 %v682_v19, %v808_v27 }
  0xcf   : > { %v1471_v20 = vpack.c.bf16 %v887_v16, %v886_v14  ;;  %v1511_v21 = vpack.c.bf16 %v903_v17, %v902_v15 }
  0xd0   : > { %v721_v22 = vpop.f32.mrf.mxu2  ;;  %v761_v23 = vpop.f32.mrf.mxu3 }
  0xd1   : > { %1555 = vst [vmem:[%s1770_s6 + $0x90] sm:$0xff] %v1471_v20   ;;  %v643_v24 = vpop.f32.mrf.mxu0  ;;  %v683_v25 = vpop.f32.mrf.mxu1  ;;  %v722_v32 = vadd.f32 %v1757_v38, %v721_v22  ;;  %v762_v33 = vadd.f32 %v1757_v38, %v761_v23 }
  0xd2   : > { %1563 = vst [vmem:[%s1770_s6 + $0xd0] sm:$0xff] %v1511_v21   ;;  %v644_v28 = vadd.f32 %v1757_v38, %v643_v24  ;;  %v684_v29 = vadd.f32 %v1757_v38, %v683_v25 }
  0xd3   : > { %v824_v43 = vmul.f32 0.2, %v722_v32  ;;  %v840_v44 = vmul.f32 0.2, %v762_v33 }
  0xd4   : > { %v793_v30 = vmul.f32 0.2, %v644_v28  ;;  %v809_v31 = vmul.f32 0.2, %v684_v29 }
  0xd5   : > { %v888_v51 = vmax.f32 %v722_v32, %v824_v43  ;;  %v904_v52 = vmax.f32 %v762_v33, %v840_v44 }
  0xd6   : > { %v857_v36 = vmax.f32 %v644_v28, %v793_v30  ;;  %v873_v37 = vmax.f32 %v684_v29, %v809_v31 }
  0xd8   : > { %v1396_v39 = vpack.c.bf16 %v857_v36, %v856_v34  ;;  %v1436_v40 = vpack.c.bf16 %v873_v37, %v872_v35  ;;  %v723_v41 = vpop.f32.mrf.mxu2  ;;  %v763_v42 = vpop.f32.mrf.mxu3 }
  0xd9   : > { %v724_v45 = vadd.f32 %v1757_v38, %v723_v41  ;;  %v764_v46 = vadd.f32 %v1757_v38, %v763_v42  ;;  %v646_v47 = vpop.f32.mrf.mxu0  ;;  %v686_v48 = vpop.f32.mrf.mxu1 }
  0xda   : > { %1540 = vst [vmem:[%s1770_s6 + $0x18] sm:$0xff] %v1396_v39   ;;  %v647_v55 = vadd.f32 %v1757_v38, %v646_v47  ;;  %v687_v56 = vadd.f32 %v1757_v38, %v686_v48 }
  0xdb   : > { %1548 = vst [vmem:[%s1770_s6 + $0x58] sm:$0xff] %v1436_v40   ;;  %v825_v49 = vmul.f32 0.2, %v724_v45  ;;  %v841_v50 = vmul.f32 0.2, %v764_v46 }
  0xdc   : > { %v794_v63 = vmul.f32 0.2, %v647_v55  ;;  %v810_v0 = vmul.f32 0.2, %v687_v56 }
  0xdd   : > { %v889_v53 = vmax.f32 %v724_v45, %v825_v49  ;;  %v905_v54 = vmax.f32 %v764_v46, %v841_v50 }
  0xde   : > { %v858_v7 = vmax.f32 %v647_v55, %v794_v63  ;;  %v874_v8 = vmax.f32 %v687_v56, %v810_v0 }
  0xdf   : > { %v1476_v57 = vpack.c.bf16 %v889_v53, %v888_v51  ;;  %v1516_v58 = vpack.c.bf16 %v905_v54, %v904_v52 }
  0xe0   : > { %v726_v59 = vpop.f32.mrf.mxu2  ;;  %v766_v60 = vpop.f32.mrf.mxu3 }
  0xe1   : > { %1556 = vst [vmem:[%s1770_s6 + $0x98] sm:$0xff] %v1476_v57   ;;  %v648_v61 = vpop.f32.mrf.mxu0  ;;  %v688_v62 = vpop.f32.mrf.mxu1  ;;  %v727_v5 = vadd.f32 %v1757_v38, %v726_v59  ;;  %v767_v6 = vadd.f32 %v1757_v38, %v766_v60 }
  0xe2   : > { %1564 = vst [vmem:[%s1770_s6 + $0xd8] sm:$0xff] %v1516_v58   ;;  %v649_v1 = vadd.f32 %v1757_v38, %v648_v61  ;;  %v689_v2 = vadd.f32 %v1757_v38, %v688_v62 }
  0xe3   : > { %v826_v15 = vmul.f32 0.2, %v727_v5  ;;  %v842_v16 = vmul.f32 0.2, %v767_v6 }
  0xe4   : > { %v795_v3 = vmul.f32 0.2, %v649_v1  ;;  %v811_v4 = vmul.f32 0.2, %v689_v2 }
  0xe5   : > { %v890_v23 = vmax.f32 %v727_v5, %v826_v15  ;;  %v906_v24 = vmax.f32 %v767_v6, %v842_v16 }
  0xe6   : > { %v859_v9 = vmax.f32 %v649_v1, %v795_v3  ;;  %v875_v10 = vmax.f32 %v689_v2, %v811_v4 }
  0xe8   : > { %v1401_v11 = vpack.c.bf16 %v859_v9, %v858_v7  ;;  %v1441_v12 = vpack.c.bf16 %v875_v10, %v874_v8  ;;  %v728_v13 = vpop.f32.mrf.mxu2  ;;  %v768_v14 = vpop.f32.mrf.mxu3 }
  0xe9   : > { %v729_v17 = vadd.f32 %v1757_v38, %v728_v13  ;;  %v769_v18 = vadd.f32 %v1757_v38, %v768_v14  ;;  %v651_v19 = vpop.f32.mrf.mxu0  ;;  %v691_v20 = vpop.f32.mrf.mxu1 }
  0xea   : > { %1541 = vst [vmem:[%s1770_s6 + $0x20] sm:$0xff] %v1401_v11   ;;  %v652_v27 = vadd.f32 %v1757_v38, %v651_v19  ;;  %v692_v28 = vadd.f32 %v1757_v38, %v691_v20 }
  0xeb   : > { %1549 = vst [vmem:[%s1770_s6 + $0x60] sm:$0xff] %v1441_v12   ;;  %v827_v21 = vmul.f32 0.2, %v729_v17  ;;  %v843_v22 = vmul.f32 0.2, %v769_v18 }
  0xec   : > { %v796_v35 = vmul.f32 0.2, %v652_v27  ;;  %v812_v36 = vmul.f32 0.2, %v692_v28 }
  0xed   : > { %v891_v25 = vmax.f32 %v729_v17, %v827_v21  ;;  %v907_v26 = vmax.f32 %v769_v18, %v843_v22 }
  0xee   : > { %v860_v44 = vmax.f32 %v652_v27, %v796_v35  ;;  %v876_v45 = vmax.f32 %v692_v28, %v812_v36 }
  0xef   : > { %v1481_v29 = vpack.c.bf16 %v891_v25, %v890_v23  ;;  %v1521_v30 = vpack.c.bf16 %v907_v26, %v906_v24 }
  0xf0   : > { %v731_v31 = vpop.f32.mrf.mxu2  ;;  %v771_v32 = vpop.f32.mrf.mxu3 }
  0xf1   : > { %1557 = vst [vmem:[%s1770_s6 + $0xa0] sm:$0xff] %v1481_v29   ;;  %v653_v33 = vpop.f32.mrf.mxu0  ;;  %v693_v34 = vpop.f32.mrf.mxu1  ;;  %v732_v42 = vadd.f32 %v1757_v38, %v731_v31  ;;  %v772_v43 = vadd.f32 %v1757_v38, %v771_v32 }
  0xf2   : > { %1565 = vst [vmem:[%s1770_s6 + $0xe0] sm:$0xff] %v1521_v30   ;;  %v654_v37 = vadd.f32 %v1757_v38, %v653_v33  ;;  %v694_v39 = vadd.f32 %v1757_v38, %v693_v34 }
  0xf3   : > { %v828_v52 = vmul.f32 0.2, %v732_v42  ;;  %v844_v53 = vmul.f32 0.2, %v772_v43 }
  0xf4   : > { %v797_v40 = vmul.f32 0.2, %v654_v37  ;;  %v813_v41 = vmul.f32 0.2, %v694_v39 }
  0xf5   : > { %v892_v60 = vmax.f32 %v732_v42, %v828_v52  ;;  %v908_v61 = vmax.f32 %v772_v43, %v844_v53 }
  0xf6   : > { %v861_v46 = vmax.f32 %v654_v37, %v797_v40  ;;  %v877_v47 = vmax.f32 %v694_v39, %v813_v41 }
  0xf8   : > { %v1406_v48 = vpack.c.bf16 %v861_v46, %v860_v44  ;;  %v1446_v49 = vpack.c.bf16 %v877_v47, %v876_v45  ;;  %v733_v50 = vpop.f32.mrf.mxu2  ;;  %v773_v51 = vpop.f32.mrf.mxu3 }
  0xf9   : > { %v734_v54 = vadd.f32 %v1757_v38, %v733_v50  ;;  %v774_v55 = vadd.f32 %v1757_v38, %v773_v51  ;;  %v656_v56 = vpop.f32.mrf.mxu0  ;;  %v696_v57 = vpop.f32.mrf.mxu1 }
  0xfa   : > { %1542 = vst [vmem:[%s1770_s6 + $0x28] sm:$0xff] %v1406_v48   ;;  %v657_v0 = vadd.f32 %v1757_v38, %v656_v56  ;;  %v697_v1 = vadd.f32 %v1757_v38, %v696_v57 }
  0xfb   : > { %1550 = vst [vmem:[%s1770_s6 + $0x68] sm:$0xff] %v1446_v49   ;;  %v829_v58 = vmul.f32 0.2, %v734_v54  ;;  %v845_v59 = vmul.f32 0.2, %v774_v55 }
  0xfc   : > { %v798_v8 = vmul.f32 0.2, %v657_v0  ;;  %v814_v9 = vmul.f32 0.2, %v697_v1 }
  0xfd   : > { %v893_v62 = vmax.f32 %v734_v54, %v829_v58  ;;  %v909_v63 = vmax.f32 %v774_v55, %v845_v59 }
  0xfe   : > { %v862_v16 = vmax.f32 %v657_v0, %v798_v8  ;;  %v878_v17 = vmax.f32 %v697_v1, %v814_v9 }
  0xff   : > { %v1486_v2 = vpack.c.bf16 %v893_v62, %v892_v60  ;;  %v1526_v3 = vpack.c.bf16 %v909_v63, %v908_v61 }
 0x100   : > { %v736_v4 = vpop.f32.mrf.mxu2  ;;  %v776_v5 = vpop.f32.mrf.mxu3 }
 0x101   : > { %1558 = vst [vmem:[%s1770_s6 + $0xa8] sm:$0xff] %v1486_v2   ;;  %v658_v6 = vpop.f32.mrf.mxu0  ;;  %v698_v7 = vpop.f32.mrf.mxu1  ;;  %v737_v14 = vadd.f32 %v1757_v38, %v736_v4  ;;  %v777_v15 = vadd.f32 %v1757_v38, %v776_v5 }
 0x102   : > { %1566 = vst [vmem:[%s1770_s6 + $0xe8] sm:$0xff] %v1526_v3   ;;  %v659_v10 = vadd.f32 %v1757_v38, %v658_v6  ;;  %v699_v11 = vadd.f32 %v1757_v38, %v698_v7 }
 0x103   : > { %v830_v24 = vmul.f32 0.2, %v737_v14  ;;  %v846_v25 = vmul.f32 0.2, %v777_v15 }
 0x104   : > { %v799_v12 = vmul.f32 0.2, %v659_v10  ;;  %v815_v13 = vmul.f32 0.2, %v699_v11 }
 0x105   : > { %v894_v32 = vmax.f32 %v737_v14, %v830_v24  ;;  %v910_v33 = vmax.f32 %v777_v15, %v846_v25 }
 0x106   : > { %v863_v18 = vmax.f32 %v659_v10, %v799_v12  ;;  %v879_v19 = vmax.f32 %v699_v11, %v815_v13 }
 0x108   : > { %v1411_v20 = vpack.c.bf16 %v863_v18, %v862_v16  ;;  %v1451_v21 = vpack.c.bf16 %v879_v19, %v878_v17  ;;  %v738_v22 = vpop.f32.mrf.mxu2  ;;  %v778_v23 = vpop.f32.mrf.mxu3 }
 0x109   : > { %v739_v26 = vadd.f32 %v1757_v38, %v738_v22  ;;  %v779_v27 = vadd.f32 %v1757_v38, %v778_v23  ;;  %v661_v28 = vpop.f32.mrf.mxu0  ;;  %v701_v29 = vpop.f32.mrf.mxu1 }
 0x10a   : > { %1543 = vst [vmem:[%s1770_s6 + $0x30] sm:$0xff] %v1411_v20   ;;  %v662_v36 = vadd.f32 %v1757_v38, %v661_v28  ;;  %v702_v37 = vadd.f32 %v1757_v38, %v701_v29 }
 0x10b   : > { %1551 = vst [vmem:[%s1770_s6 + $0x70] sm:$0xff] %v1451_v21   ;;  %v831_v30 = vmul.f32 0.2, %v739_v26  ;;  %v847_v31 = vmul.f32 0.2, %v779_v27 }
 0x10c   : > { %v800_v45 = vmul.f32 0.2, %v662_v36  ;;  %v816_v46 = vmul.f32 0.2, %v702_v37 }
 0x10d   : > { %v895_v34 = vmax.f32 %v739_v26, %v831_v30  ;;  %v911_v35 = vmax.f32 %v779_v27, %v847_v31 }
 0x10e   : > { %v864_v53 = vmax.f32 %v662_v36, %v800_v45  ;;  %v880_v54 = vmax.f32 %v702_v37, %v816_v46 }
 0x10f   : > { %v1491_v39 = vpack.c.bf16 %v895_v34, %v894_v32  ;;  %v1531_v40 = vpack.c.bf16 %v911_v35, %v910_v33 }
 0x110   : > { %v741_v41 = vpop.f32.mrf.mxu2  ;;  %v781_v42 = vpop.f32.mrf.mxu3 }
 0x111   : > { %1559 = vst [vmem:[%s1770_s6 + $0xb0] sm:$0xff] %v1491_v39   ;;  %v663_v43 = vpop.f32.mrf.mxu0  ;;  %v703_v44 = vpop.f32.mrf.mxu1  ;;  %v742_v51 = vadd.f32 %v1757_v38, %v741_v41  ;;  %v782_v52 = vadd.f32 %v1757_v38, %v781_v42 }
 0x112   : > { %1567 = vst [vmem:[%s1770_s6 + $0xf0] sm:$0xff] %v1531_v40   ;;  %v664_v47 = vadd.f32 %v1757_v38, %v663_v43  ;;  %v704_v48 = vadd.f32 %v1757_v38, %v703_v44 }
 0x113   : > { %v832_v61 = vmul.f32 0.2, %v742_v51  ;;  %v848_v62 = vmul.f32 0.2, %v782_v52 }
 0x114   : > { %v801_v49 = vmul.f32 0.2, %v664_v47  ;;  %v817_v50 = vmul.f32 0.2, %v704_v48 }
 0x115   : > { %v896_v3 = vmax.f32 %v742_v51, %v832_v61  ;;  %v912_v4 = vmax.f32 %v782_v52, %v848_v62 }
 0x116   : > { %v865_v55 = vmax.f32 %v664_v47, %v801_v49  ;;  %v881_v56 = vmax.f32 %v704_v48, %v817_v50 }
 0x118   : > { %v1416_v57 = vpack.c.bf16 %v865_v55, %v864_v53  ;;  %v1456_v58 = vpack.c.bf16 %v881_v56, %v880_v54  ;;  %v743_v59 = vpop.f32.mrf.mxu2  ;;  %v783_v60 = vpop.f32.mrf.mxu3 }
 0x119   : > { %v744_v63 = vadd.f32 %v1757_v38, %v743_v59  ;;  %v784_v0 = vadd.f32 %v1757_v38, %v783_v60 }
 0x11a   : > { %1544 = vst [vmem:[%s1770_s6 + $0x38] sm:$0xff] %v1416_v57  }
 0x11b   : > { %1552 = vst [vmem:[%s1770_s6 + $0x78] sm:$0xff] %v1456_v58   ;;  %v833_v1 = vmul.f32 0.2, %v744_v63  ;;  %v849_v2 = vmul.f32 0.2, %v784_v0 }
 0x11d   : > { %v897_v5 = vmax.f32 %v744_v63, %v833_v1  ;;  %v913_v6 = vmax.f32 %v784_v0, %v849_v2 }
 0x11f   : > { %v1496_v7 = vpack.c.bf16 %v897_v5, %v896_v3  ;;  %v1536_v8 = vpack.c.bf16 %v913_v6, %v912_v4 }
 0x121   : > { %1560 = vst [vmem:[%s1770_s6 + $0xb8] sm:$0xff] %v1496_v7  }
 0x122   : > { %1568 = vst [vmem:[%s1770_s6 + $0xf8] sm:$0xff] %v1536_v8  }
 0x123 PF: > { %s13_s14 = sadd.s32 1, %s1628_s14   ;;  %s1875_s12 = smov %s1624_s13 }
 0x124   : > { %p10_p5 = scmp.ge.s32.totalorder %s13_s14, 6   ;;  %s1876_s13 = smov %s1878_s15 }
 0x126   :  { %12 = sbr.rel (!%p10_p5) target bundleno = 2 (0x2), region = 68 }

// kernel: discriminator_forward.6
= control target key start
LH: loop header
LB: loop body
LE: loop exit
PB: predicated region body
PF: predicated region fallthrough
CT: control target
= control target key end

     0   :  { %s1310_s18 = smov 0   ;;  %s1312_s19 = smov 0   ;;  %s1535_s0 = inlined_call_operand.vmem [shape: bf16[512,128], index: 0, kind: input, shape index: {}]   ;;  %s1536_s1 = inlined_call_operand.vmem [shape: bf16[128,128], index: 1, kind: input, shape index: {}]   ;;  %s1537_s2 = inlined_call_operand.vmem [shape: f32[1,128], index: 2, kind: input, shape index: {}]   ;;  %s1538_s3 = inlined_call_operand.vmem [shape: bf16[512,128], index: 3, kind: output, shape index: {0}]   ;;  %s1539_s4 = inlined_call_operand.vmem [shape: f32[2,1,128], index: 4, kind: output, shape index: {1}]   ;;  %s1540_s5 = inlined_call_operand.vmem [shape: f32[2,1,128], index: 5, kind: output, shape index: {2}]  }
   0x1   :  { %s1314_s20 = smov 0  }
   0x2 LB: > { %s35_s2 = sadd.s32 1, %s1274_s19  ;;  %p986_p0 = scmp.ge.s32.totalorder %s1278_s20, 1  ;;  %s1278_s20 = sphi %s1314_s20, %s16_s20   ;;  %s1274_s19 = sphi %s1312_s19, %s1542_s19   ;;  %s1270_s18 = sphi %s1310_s18, %s1541_s18  }
   0x3   : > { %p37_p1 = scmp.ge.s32.totalorder %s35_s2, 2  ;;  %p247_p2 = scmp.lt.s32.totalorder %s1278_s20, 3 }
   0x5   : > { %s1544_s2 = smov (%p37_p1, %s35_s2), 0  ;;  %p248_p3 = pnand %p986_p0, %p247_p2 }
   0x6   : > { %s987_s29 = sshll.u32 (!%p248_p3), %s1270_s18, 5  ;;  %p334_p5 = scmp.lt.s32.totalorder (!%p248_p3), %s1270_s18, 1 }
   0x7   : > { %251 = sbr.rel (%p248_p3) target bundleno = 291 (0x123), region = 32  ;;  %p305_p4 = scmp.lt.s32.totalorder (!%p248_p3), %s987_s29, 63 }
   0xc   : > { %v1112_v0 = vld [vmem:[%s1536_s1 + $0x38] sm:$0xff]  ;;  %v1111_v1 = vld [vmem:[%s1536_s1 + $0x30] sm:$0xff]  ;;  %v1110_v2 = vld [vmem:[%s1536_s1 + $0x28] sm:$0xff]  ;;  %s1546_s29 = smov (!%p305_p4, %s987_s29), 63  ;;  %s1548_s18 = smov (!%p334_p5, %s1270_s18), 1 }
   0xd   : > { %538 = vmatpush.bf16.msra.mxu0 %v1112_v0  ;;  %1208 = vmatpush.bf16.msra.mxu1 %v1112_v0  ;;  %v1109_v3 = vld [vmem:[%s1536_s1 + $0x20] sm:$0xff]  ;;  %v1108_v4 = vld [vmem:[%s1536_s1 + $0x18] sm:$0xff]  ;;  %v1107_v5 = vld [vmem:[%s1536_s1 + $0x10] sm:$0xff]  ;;  %s988_s11 = sshll.u32 %s1546_s29, 2  ;;  %s339_s25 = scalar_lea.vmem %s1539_s4, %s1548_s18 }
   0xe   : > { %1209 = vmatpush.bf16.msra.mxu2 %v1112_v0  ;;  %1210 = vmatpush.bf16.msra.mxu3 %v1112_v0  ;;  %v1106_v6 = vld [vmem:[%s1536_s1 + $0x8] sm:$0xff]  ;;  %v1105_v7 = vld [vmem:[%s1536_s1] sm:$0xff]  ;;  %s1363_s16 = scalar_lea.vmem %s1535_s0, %s988_s11  ;;  %s1390_s22 = scalar_lea.vmem %s1538_s3, %s988_s11 }
   0xf   : > { %v1089_v8 = vld [vmem:[%s1363_s16] sm:$0xff]  ;;  %v1090_v12 = vld [vmem:[%s1363_s16 + $0x8] sm:$0xff]  ;;  %v1091_v16 = vld [vmem:[%s1363_s16 + $0x10] sm:$0xff]  ;;  %s345_s28 = scalar_lea.vmem %s1540_s5, %s1548_s18 }
  0x10   : > { %v1093_v9 = vld [vmem:[%s1363_s16 + $0x20] sm:$0xff]  ;;  %v1094_v13 = vld [vmem:[%s1363_s16 + $0x28] sm:$0xff]  ;;  %v1095_v17 = vld [vmem:[%s1363_s16 + $0x30] sm:$0xff] }
  0x11   : > { %539 = vmatpush.bf16.msra.mxu0 %v1111_v1  ;;  %1211 = vmatpush.bf16.msra.mxu1 %v1111_v1  ;;  %v1097_v10 = vld [vmem:[%s1363_s16 + $0x40] sm:$0xff]  ;;  %v1098_v14 = vld [vmem:[%s1363_s16 + $0x48] sm:$0xff]  ;;  %v1099_v18 = vld [vmem:[%s1363_s16 + $0x50] sm:$0xff] }
  0x12   : > { %1212 = vmatpush.bf16.msra.mxu2 %v1111_v1  ;;  %1213 = vmatpush.bf16.msra.mxu3 %v1111_v1  ;;  %v1101_v11 = vld [vmem:[%s1363_s16 + $0x60] sm:$0xff]  ;;  %v1102_v15 = vld [vmem:[%s1363_s16 + $0x68] sm:$0xff]  ;;  %v1103_v19 = vld [vmem:[%s1363_s16 + $0x70] sm:$0xff] }
  0x13   : > { %v1092_v20 = vld [vmem:[%s1363_s16 + $0x18] sm:$0xff] }
  0x14   : > { %v1096_v21 = vld [vmem:[%s1363_s16 + $0x38] sm:$0xff] }
  0x15   : > { %540 = vmatpush.bf16.msra.mxu0 %v1110_v2  ;;  %1214 = vmatpush.bf16.msra.mxu1 %v1110_v2  ;;  %v1100_v22 = vld [vmem:[%s1363_s16 + $0x58] sm:$0xff] }
  0x16   : > { %1215 = vmatpush.bf16.msra.mxu2 %v1110_v2  ;;  %1216 = vmatpush.bf16.msra.mxu3 %v1110_v2  ;;  %v1104_v23 = vld [vmem:[%s1363_s16 + $0x78] sm:$0xff] }
  0x19   : > { %541 = vmatpush.bf16.msra.mxu0 %v1109_v3  ;;  %1217 = vmatpush.bf16.msra.mxu1 %v1109_v3 }
  0x1a   : > { %1218 = vmatpush.bf16.msra.mxu2 %v1109_v3  ;;  %1219 = vmatpush.bf16.msra.mxu3 %v1109_v3 }
  0x1d   : > { %542 = vmatpush.bf16.msra.mxu0 %v1108_v4  ;;  %1220 = vmatpush.bf16.msra.mxu1 %v1108_v4 }
  0x1e   : > { %1221 = vmatpush.bf16.msra.mxu2 %v1108_v4  ;;  %1222 = vmatpush.bf16.msra.mxu3 %v1108_v4 }
  0x21   : > { %543 = vmatpush.bf16.msra.mxu0 %v1107_v5  ;;  %1223 = vmatpush.bf16.msra.mxu1 %v1107_v5 }
  0x22   : > { %1224 = vmatpush.bf16.msra.mxu2 %v1107_v5  ;;  %1225 = vmatpush.bf16.msra.mxu3 %v1107_v5 }
  0x25   : > { %544 = vmatpush.bf16.msra.mxu0 %v1106_v6  ;;  %1226 = vmatpush.bf16.msra.mxu1 %v1106_v6 }
  0x26   : > { %1227 = vmatpush.bf16.msra.mxu2 %v1106_v6  ;;  %1228 = vmatpush.bf16.msra.mxu3 %v1106_v6 }
  0x29   : > { %545 = vmatpush.bf16.msra.mxu0 %v1105_v7  ;;  %1229 = vmatpush.bf16.msra.mxu1 %v1105_v7 }
  0x2a   : > { %1230 = vmatpush.bf16.msra.mxu2 %v1105_v7  ;;  %1231 = vmatpush.bf16.msra.mxu3 %v1105_v7 }
  0x2c   : > { %546 = vmatmul.bf16.vlgmr.msra.gmra.mxu0 %v1089_v8  ;;  %566 = vmatmul.bf16.vlgmr.msra.gmra.mxu1 %v1093_v9 }
  0x2d   : > { %586 = vmatmul.bf16.vlgmr.msra.gmra.mxu2 %v1097_v10  ;;  %606 = vmatmul.bf16.vlgmr.msra.gmra.mxu3 %v1101_v11 }
  0x3c   : > { %551 = vmatmul.bf16.gmra.mxu0 %v1090_v12  ;;  %571 = vmatmul.bf16.gmra.mxu1 %v1094_v13 }
  0x3d   : > { %591 = vmatmul.bf16.gmra.mxu2 %v1098_v14  ;;  %611 = vmatmul.bf16.gmra.mxu3 %v1102_v15 }
  0x4c   : > { %556 = vmatmul.bf16.gmra.mxu0 %v1091_v16  ;;  %576 = vmatmul.bf16.gmra.mxu1 %v1095_v17 }
  0x4d   : > { %596 = vmatmul.bf16.gmra.mxu2 %v1099_v18  ;;  %616 = vmatmul.bf16.gmra.mxu3 %v1103_v19 }
  0x5c   : > { %561 = vmatmul.bf16.gmra.mxu0 %v1092_v20  ;;  %581 = vmatmul.bf16.gmra.mxu1 %v1096_v21 }
  0x5d   : > { %601 = vmatmul.bf16.gmra.mxu2 %v1100_v22  ;;  %621 = vmatmul.bf16.gmra.mxu3 %v1104_v23 }
  0xa9   : > { %v547_v24 = vpop.f32.mrf.mxu0  ;;  %v1381_v25 = vpop.f32.mrf.mxu1 }
  0xaa   : > { %v665_v57 = vmul.f32 %v547_v24, %v547_v24 }
  0xb0   : > { %v1383_v26 = vpop.f32.mrf.mxu2  ;;  %v1394_v30 = vpop.f32.mrf.mxu3 }
  0xb1   : > { %v549_v27 = vpop.f32.mrf.mxu0  ;;  %v1392_v28 = vpop.f32.mrf.mxu1 }
  0xb2   : > { %v1116_v29 = vpack.c.bf16 %v549_v27, %v547_v24  ;;  %v1136_v31 = vpack.c.bf16 %v1392_v28, %v1381_v25  ;;  %v666_v56 = vmul.f32 %v549_v27, %v549_v27  ;;  %v627_v58 = vadd.f32 %v549_v27, %v547_v24 }
  0xb3   : > { %v673_v27 = vmul.f32 %v1381_v25, %v1381_v25 }
  0xb4   : > { %1117 = vst [vmem:[%s1390_s22] sm:$0xff] %v1116_v29   ;;  %v697_v60 = vadd.f32 %v666_v56, %v665_v57 }
  0xb5   : > { %1196 = vst [vmem:[%s1390_s22 + $0x20] sm:$0xff] %v1136_v31  }
  0xb8   : > { %v1400_v32 = vpop.f32.mrf.mxu2  ;;  %v1406_v36 = vpop.f32.mrf.mxu3 }
  0xb9   : > { %v552_v33 = vpop.f32.mrf.mxu0  ;;  %v1402_v34 = vpop.f32.mrf.mxu1  ;;  %v1156_v35 = vpack.c.bf16 %v1400_v32, %v1383_v26  ;;  %v1176_v37 = vpack.c.bf16 %v1406_v36, %v1394_v30 }
  0xba   : > { %v667_v59 = vmul.f32 %v552_v33, %v552_v33  ;;  %v628_v61 = vadd.f32 %v627_v58, %v552_v33 }
  0xbb   : > { %1200 = vst [vmem:[%s1390_s22 + $0x40] sm:$0xff] %v1156_v35  }
  0xbc   : > { %1204 = vst [vmem:[%s1390_s22 + $0x60] sm:$0xff] %v1176_v37   ;;  %v698_v3 = vadd.f32 %v697_v60, %v667_v59 }
  0xc0   : > { %v1412_v38 = vpop.f32.mrf.mxu2  ;;  %v1416_v42 = vpop.f32.mrf.mxu3 }
  0xc1   : > { %v554_v39 = vpop.f32.mrf.mxu0  ;;  %v1414_v40 = vpop.f32.mrf.mxu1 }
  0xc2   : > { %v1121_v41 = vpack.c.bf16 %v554_v39, %v552_v33  ;;  %v1141_v43 = vpack.c.bf16 %v1414_v40, %v1402_v34  ;;  %v668_v62 = vmul.f32 %v554_v39, %v554_v39  ;;  %v629_v4 = vadd.f32 %v628_v61, %v554_v39 }
  0xc3   : > { %v674_v33 = vmul.f32 %v1392_v28, %v1392_v28  ;;  %v675_v39 = vmul.f32 %v1402_v34, %v1402_v34 }
  0xc4   : > { %1193 = vst [vmem:[%s1390_s22 + $0x8] sm:$0xff] %v1121_v41   ;;  %v699_v8 = vadd.f32 %v698_v3, %v668_v62  ;;  %v681_v3 = vmul.f32 %v1383_v26, %v1383_v26 }
  0xc5   : > { %1197 = vst [vmem:[%s1390_s22 + $0x28] sm:$0xff] %v1141_v43  }
  0xc8   : > { %v1422_v44 = vpop.f32.mrf.mxu2  ;;  %v1428_v48 = vpop.f32.mrf.mxu3 }
  0xc9   : > { %v557_v45 = vpop.f32.mrf.mxu0  ;;  %v1424_v46 = vpop.f32.mrf.mxu1  ;;  %v1161_v47 = vpack.c.bf16 %v1422_v44, %v1412_v38  ;;  %v1181_v49 = vpack.c.bf16 %v1428_v48, %v1416_v42 }
  0xca   : > { %v669_v5 = vmul.f32 %v557_v45, %v557_v45  ;;  %v630_v9 = vadd.f32 %v629_v4, %v557_v45 }
  0xcb   : > { %1201 = vst [vmem:[%s1390_s22 + $0x48] sm:$0xff] %v1161_v47  }
  0xcc   : > { %1205 = vst [vmem:[%s1390_s22 + $0x68] sm:$0xff] %v1181_v49   ;;  %v700_v11 = vadd.f32 %v699_v8, %v669_v5  ;;  %v682_v5 = vmul.f32 %v1400_v32, %v1400_v32 }
  0xd0   : > { %v1434_v50 = vpop.f32.mrf.mxu2  ;;  %v1438_v54 = vpop.f32.mrf.mxu3 }
  0xd1   : > { %v559_v51 = vpop.f32.mrf.mxu0  ;;  %v1436_v52 = vpop.f32.mrf.mxu1 }
  0xd2   : > { %v1126_v53 = vpack.c.bf16 %v559_v51, %v557_v45  ;;  %v1146_v55 = vpack.c.bf16 %v1436_v52, %v1424_v46  ;;  %v670_v10 = vmul.f32 %v559_v51, %v559_v51  ;;  %v631_v12 = vadd.f32 %v630_v9, %v559_v51 }
  0xd4   : > { %1194 = vst [vmem:[%s1390_s22 + $0x10] sm:$0xff] %v1126_v53   ;;  %v701_v14 = vadd.f32 %v700_v11, %v670_v10  ;;  %v684_v10 = vmul.f32 %v1422_v44, %v1422_v44 }
  0xd5   : > { %1198 = vst [vmem:[%s1390_s22 + $0x30] sm:$0xff] %v1146_v55   ;;  %v677_v55 = vmul.f32 %v1424_v46, %v1424_v46 }
  0xd8   : > { %v1444_v63 = vpop.f32.mrf.mxu2  ;;  %v1448_v6 = vpop.f32.mrf.mxu3 }
  0xd9   : > { %v562_v0 = vpop.f32.mrf.mxu0  ;;  %v582_v1 = vpop.f32.mrf.mxu1  ;;  %v1166_v2 = vpack.c.bf16 %v1444_v63, %v1434_v50  ;;  %v1186_v7 = vpack.c.bf16 %v1448_v6, %v1438_v54 }
  0xda   : > { %v671_v13 = vmul.f32 %v562_v0, %v562_v0  ;;  %v632_v15 = vadd.f32 %v631_v12, %v562_v0  ;;  %v679_v61 = vmul.f32 %v582_v1, %v582_v1 }
  0xdb   : > { %1202 = vst [vmem:[%s1390_s22 + $0x50] sm:$0xff] %v1166_v2  }
  0xdc   : > { %1206 = vst [vmem:[%s1390_s22 + $0x70] sm:$0xff] %v1186_v7   ;;  %v702_v19 = vadd.f32 %v701_v14, %v671_v13 }
  0xe0   : > { %v602_v16 = vpop.f32.mrf.mxu2  ;;  %v1454_v23 = vpop.f32.mrf.mxu3 }
  0xe1   : > { %v564_v17 = vpop.f32.mrf.mxu0  ;;  %v584_v18 = vpop.f32.mrf.mxu1 }
  0xe2   : > { %v633_v20 = vadd.f32 %v632_v15, %v564_v17  ;;  %v672_v21 = vmul.f32 %v564_v17, %v564_v17  ;;  %v1131_v22 = vpack.c.bf16 %v564_v17, %v562_v0  ;;  %v1151_v24 = vpack.c.bf16 %v584_v18, %v582_v1 }
  0xe3   : > { %v680_v2 = vmul.f32 %v584_v18, %v584_v18  ;;  %v686_v15 = vmul.f32 %v1444_v63, %v1444_v63 }
  0xe4   : > { %v634_v29 = vadd.f32 %v633_v20, %v1381_v25  ;;  %v703_v31 = vadd.f32 %v702_v19, %v672_v21  ;;  %1195 = vst [vmem:[%s1390_s22 + $0x18] sm:$0xff] %v1131_v22   ;;  %v676_v25 = vmul.f32 %v1414_v40, %v1414_v40  ;;  %v687_v19 = vmul.f32 %v602_v16, %v602_v16 }
  0xe5   : > { %1199 = vst [vmem:[%s1390_s22 + $0x38] sm:$0xff] %v1151_v24  }
  0xe6   : > { %v635_v35 = vadd.f32 %v634_v29, %v1392_v28  ;;  %v704_v37 = vadd.f32 %v703_v31, %v673_v27 }
  0xe8   : > { %v636_v41 = vadd.f32 %v635_v35, %v1402_v34  ;;  %v705_v43 = vadd.f32 %v704_v37, %v674_v33  ;;  %v604_v45 = vpop.f32.mrf.mxu2  ;;  %v624_v53 = vpop.f32.mrf.mxu3  ;;  %v678_v34 = vmul.f32 %v1436_v52, %v1436_v52  ;;  %v692_v35 = vmul.f32 %v1428_v48, %v1428_v48 }
  0xe9   : > { %v1171_v47 = vpack.c.bf16 %v604_v45, %v602_v16  ;;  %v1191_v28 = vpack.c.bf16 %v624_v53, %v1454_v23  ;;  %v688_v22 = vmul.f32 %v604_v45, %v604_v45 }
  0xea   : > { %v706_v49 = vadd.f32 %v705_v43, %v675_v39  ;;  %v637_v51 = vadd.f32 %v636_v41, %v1414_v40  ;;  %v693_v39 = vmul.f32 %v1438_v54, %v1438_v54 }
  0xeb   : > { %1203 = vst [vmem:[%s1390_s22 + $0x58] sm:$0xff] %v1171_v47  }
  0xec   : > { %v638_v56 = vadd.f32 %v637_v51, %v1424_v46  ;;  %v707_v57 = vadd.f32 %v706_v49, %v676_v25  ;;  %1207 = vst [vmem:[%s1390_s22 + $0x78] sm:$0xff] %v1191_v28   ;;  %v695_v49 = vmul.f32 %v1454_v23, %v1454_v23  ;;  %v696_v28 = vmul.f32 %v624_v53, %v624_v53 }
  0xee   : > { %v639_v58 = vadd.f32 %v638_v56, %v1436_v52  ;;  %v708_v59 = vadd.f32 %v707_v57, %v677_v55  ;;  %v683_v52 = vmul.f32 %v1412_v38, %v1412_v38 }
  0xf0   : > { %v640_v60 = vadd.f32 %v639_v58, %v582_v1  ;;  %v709_v40 = vadd.f32 %v708_v59, %v678_v34 }
  0xf2   : > { %v710_v62 = vadd.f32 %v709_v40, %v679_v61  ;;  %v641_v0 = vadd.f32 %v640_v60, %v584_v18 }
  0xf4   : > { %v642_v4 = vadd.f32 %v641_v0, %v1383_v26  ;;  %v711_v46 = vadd.f32 %v710_v62, %v680_v2  ;;  %v685_v26 = vmul.f32 %v1434_v50, %v1434_v50 }
  0xf6   : > { %v643_v7 = vadd.f32 %v642_v4, %v1400_v32  ;;  %v712_v8 = vadd.f32 %v711_v46, %v681_v3 }
  0xf8   : > { %v644_v1 = vadd.f32 %v643_v7, %v1412_v38  ;;  %v713_v9 = vadd.f32 %v712_v8, %v682_v5 }
  0xfa   : > { %v714_v11 = vadd.f32 %v713_v9, %v683_v52  ;;  %v645_v12 = vadd.f32 %v644_v1, %v1422_v44  ;;  %v689_v44 = vmul.f32 %v1394_v30, %v1394_v30 }
  0xfc   : > { %v646_v13 = vadd.f32 %v645_v12, %v1434_v50  ;;  %v715_v14 = vadd.f32 %v714_v11, %v684_v10  ;;  %v690_v50 = vmul.f32 %v1406_v36, %v1406_v36 }
  0xfe   : > { %v647_v32 = vadd.f32 %v646_v13, %v1444_v63  ;;  %v716_v17 = vadd.f32 %v715_v14, %v685_v26  ;;  %v691_v63 = vmul.f32 %v1416_v42, %v1416_v42 }
 0x100   : > { %v717_v38 = vadd.f32 %v716_v17, %v686_v15  ;;  %v648_v18 = vadd.f32 %v647_v32, %v602_v16 }
 0x102   : > { %v718_v20 = vadd.f32 %v717_v38, %v687_v19  ;;  %v649_v21 = vadd.f32 %v648_v18, %v604_v45 }
 0x104   : > { %v650_v24 = vadd.f32 %v649_v21, %v1394_v30  ;;  %v719_v27 = vadd.f32 %v718_v20, %v688_v22 }
 0x106   : > { %v651_v29 = vadd.f32 %v650_v24, %v1406_v36  ;;  %v720_v31 = vadd.f32 %v719_v27, %v689_v44 }
 0x108   : > { %v652_v16 = vadd.f32 %v651_v29, %v1416_v42  ;;  %v721_v33 = vadd.f32 %v720_v31, %v690_v50  ;;  %v694_v42 = vmul.f32 %v1448_v6, %v1448_v6 }
 0x10a   : > { %v722_v37 = vadd.f32 %v721_v33, %v691_v63  ;;  %v653_v30 = vadd.f32 %v652_v16, %v1428_v48 }
 0x10c   : > { %v654_v41 = vadd.f32 %v653_v30, %v1438_v54  ;;  %v723_v36 = vadd.f32 %v722_v37, %v692_v35 }
 0x10e   : > { %v655_v43 = vadd.f32 %v654_v41, %v1448_v6  ;;  %v724_v45 = vadd.f32 %v723_v36, %v693_v39 }
 0x110   : > { %v725_v47 = vadd.f32 %v724_v45, %v694_v42  ;;  %v656_v25 = vadd.f32 %v655_v43, %v1454_v23 }
 0x112   : > { %v726_v48 = vadd.f32 %v725_v47, %v695_v49  ;;  %v657_v51 = vadd.f32 %v656_v25, %v624_v53 }
 0x114   : > { %v658_v55 = vrot.slane %v657_v51, 4  ;;  %v727_v56 = vadd.f32 %v726_v48, %v696_v28 }
 0x116   : > { %v659_v54 = vadd.f32 %v658_v55, %v657_v51  ;;  %v728_v57 = vrot.slane %v727_v56, 4 }
 0x118   : > { %v660_v34 = vrot.slane %v659_v54, 2  ;;  %v729_v58 = vadd.f32 %v728_v57, %v727_v56 }
 0x11a   : > { %v661_v59 = vadd.f32 %v660_v34, %v659_v54  ;;  %v730_v6 = vrot.slane %v729_v58, 2 }
 0x11c   : > { %v662_v60 = vrot.slane %v661_v59, 1  ;;  %v731_v61 = vadd.f32 %v730_v6, %v729_v58 }
 0x11e   : > { %v663_v23 = vadd.f32 %v662_v60, %v661_v59  ;;  %v732_v40 = vrot.slane %v731_v61, 1 }
 0x120   : > { %664 = vst [vmem:[%s339_s25] sm:$0x1] %v663_v23  ;;  %v733_v53 = vadd.f32 %v732_v40, %v731_v61 }
 0x122   : > { %734 = vst [vmem:[%s345_s28] sm:$0x1] %v733_v53 }
 0x123 PF: > { %s16_s20 = sadd.s32 1, %s1278_s20   ;;  %s1541_s18 = smov %s1274_s19 }
 0x124   : > { %p13_p6 = scmp.ge.s32.totalorder %s16_s20, 4   ;;  %s1542_s19 = smov %s1544_s2 }
 0x126   :  { %15 = sbr.rel (!%p13_p6) target bundleno = 2 (0x2), region = 92 }

// kernel: discriminator_forward.7
= control target key start
LH: loop header
LB: loop body
LE: loop exit
PB: predicated region body
PF: predicated region fallthrough
CT: control target
= control target key end

     0   :  { %s1076_s18 = smov 0   ;;  %s1078_s19 = smov 0   ;;  %s1196_s0 = inlined_call_operand.vmem [shape: bf16[128,256], index: 0, kind: input, shape index: {}]   ;;  %s1197_s1 = inlined_call_operand.vmem [shape: bf16[256,128], index: 1, kind: input, shape index: {}]   ;;  %s1198_s2 = inlined_call_operand.vmem [shape: f32[1,128], index: 2, kind: input, shape index: {}]   ;;  %s1199_s3 = inlined_call_operand.vmem [shape: bf16[128,128], index: 3, kind: output, shape index: {0}]   ;;  %s1200_s4 = inlined_call_operand.vmem [shape: f32[2,1,128], index: 4, kind: output, shape index: {1}]   ;;  %s1201_s5 = inlined_call_operand.vmem [shape: f32[2,1,128], index: 5, kind: output, shape index: {2}]  }
   0x1   :  { %s1080_s20 = smov 0  }
   0x2 LB: > { %s35_s2 = sadd.s32 1, %s1040_s19  ;;  %p830_p0 = scmp.ge.s32.totalorder %s1044_s20, 1  ;;  %s1044_s20 = sphi %s1080_s20, %s16_s20   ;;  %s1040_s19 = sphi %s1078_s19, %s1203_s19   ;;  %s1036_s18 = sphi %s1076_s18, %s1202_s18  }
   0x3   : > { %p37_p1 = scmp.ge.s32.totalorder %s35_s2, 2  ;;  %p250_p2 = scmp.lt.s32.totalorder %s1044_s20, 3 }
   0x5   : > { %s1205_s2 = smov (%p37_p1, %s35_s2), 0  ;;  %p251_p3 = pnand %p830_p0, %p250_p2 }
   0x6   : > { %s831_s8 = sshll.u32 (!%p251_p3), %s1036_s18, 3  ;;  %p342_p5 = scmp.lt.s32.totalorder (!%p251_p3), %s1036_s18, 1 }
   0x7   : > { %254 = sbr.rel (%p251_p3) target bundleno = 222 (0xde), region = 32  ;;  %p311_p4 = scmp.lt.s32.totalorder (!%p251_p3), %s831_s8, 15 }
   0xc   : > { %v950_v0 = vld [vmem:[%s1197_s1 + $0x38] sm:$0xff]  ;;  %v949_v2 = vld [vmem:[%s1197_s1 + $0x30] sm:$0xff]  ;;  %v948_v4 = vld [vmem:[%s1197_s1 + $0x28] sm:$0xff]  ;;  %s1207_s8 = smov (!%p311_p4, %s831_s8), 15  ;;  %s1209_s18 = smov (!%p342_p5, %s1036_s18), 1 }
   0xd   : > { %v958_v1 = vld [vmem:[%s1197_s1 + $0x78] sm:$0xff]  ;;  %530 = vmatpush.bf16.msra.mxu0 %v950_v0  ;;  %982 = vmatpush.bf16.msra.mxu2 %v950_v0  ;;  %v957_v3 = vld [vmem:[%s1197_s1 + $0x70] sm:$0xff]  ;;  %v956_v5 = vld [vmem:[%s1197_s1 + $0x68] sm:$0xff]  ;;  %s934_s24 = sshll.u32 %s1207_s8, 3  ;;  %s835_s12 = sshll.u32 %s1207_s8, 2 }
   0xe   : > { %559 = vmatpush.bf16.msra.mxu1 %v958_v1  ;;  %990 = vmatpush.bf16.msra.mxu3 %v958_v1  ;;  %v947_v6 = vld [vmem:[%s1197_s1 + $0x20] sm:$0xff]  ;;  %v946_v8 = vld [vmem:[%s1197_s1 + $0x18] sm:$0xff]  ;;  %v945_v10 = vld [vmem:[%s1197_s1 + $0x10] sm:$0xff]  ;;  %s1142_s29 = scalar_lea.vmem %s1196_s0, %s934_s24  ;;  %s1173_s15 = scalar_lea.vmem %s1199_s3, %s835_s12 }
   0xf   : > { %v955_v7 = vld [vmem:[%s1197_s1 + $0x60] sm:$0xff]  ;;  %v954_v9 = vld [vmem:[%s1197_s1 + $0x58] sm:$0xff]  ;;  %v953_v11 = vld [vmem:[%s1197_s1 + $0x50] sm:$0xff]  ;;  %s347_s17 = scalar_lea.vmem %s1200_s4, %s1209_s18  ;;  %s353_s23 = scalar_lea.vmem %s1201_s5, %s1209_s18 }
  0x10   : > { %v944_v12 = vld [vmem:[%s1197_s1 + $0x8] sm:$0xff]  ;;  %v943_v14 = vld [vmem:[%s1197_s1] sm:$0xff]  ;;  %v846_v28 = vld [vmem:[%s1142_s29 + $0x10] sm:$0xf] }
  0x11   : > { %531 = vmatpush.bf16.msra.mxu0 %v949_v2  ;;  %983 = vmatpush.bf16.msra.mxu2 %v949_v2  ;;  %v952_v13 = vld [vmem:[%s1197_s1 + $0x48] sm:$0xff]  ;;  %v951_v15 = vld [vmem:[%s1197_s1 + $0x40] sm:$0xff]  ;;  %v938_v29 = vld [vmem:[%s1142_s29 + $0x14] sm:$0xf0] }
  0x12   : > { %560 = vmatpush.bf16.msra.mxu1 %v957_v3  ;;  %991 = vmatpush.bf16.msra.mxu3 %v957_v3  ;;  %v838_v16 = vld [vmem:[%s1142_s29] sm:$0xf]  ;;  %v936_v17 = vld [vmem:[%s1142_s29 + $0x4] sm:$0xf0]  ;;  %v935_v20 = vld [vmem:[%s1142_s29 + $0x4] sm:$0xf]  ;;  %v847_v36 = vor.u32 %v938_v29, %v846_v28 }
  0x13   : > { %v854_v18 = vld [vmem:[%s1142_s29 + $0x20] sm:$0xf]  ;;  %v940_v19 = vld [vmem:[%s1142_s29 + $0x24] sm:$0xf0]  ;;  %v840_v21 = vld [vmem:[%s1142_s29 + $0x8] sm:$0xf0]  ;;  %v839_v24 = vor.u32 %v936_v17, %v838_v16 }
  0x14   : > { %v939_v22 = vld [vmem:[%s1142_s29 + $0x24] sm:$0xf]  ;;  %v856_v23 = vld [vmem:[%s1142_s29 + $0x28] sm:$0xf0]  ;;  %v855_v25 = vor.u32 %v940_v19, %v854_v18  ;;  %v843_v26 = vor.u32 %v935_v20, %v840_v21  ;;  %v862_v30 = vld [vmem:[%s1142_s29 + $0x30] sm:$0xf] }
  0x15   : > { %532 = vmatpush.bf16.msra.mxu0 %v948_v4  ;;  %984 = vmatpush.bf16.msra.mxu2 %v948_v4  ;;  %v859_v27 = vor.u32 %v939_v22, %v856_v23  ;;  %v942_v31 = vld [vmem:[%s1142_s29 + $0x34] sm:$0xf0]  ;;  %v937_v32 = vld [vmem:[%s1142_s29 + $0x14] sm:$0xf]  ;;  %v848_v33 = vld [vmem:[%s1142_s29 + $0x18] sm:$0xf0] }
  0x16   : > { %561 = vmatpush.bf16.msra.mxu1 %v956_v5  ;;  %992 = vmatpush.bf16.msra.mxu3 %v956_v5  ;;  %v941_v34 = vld [vmem:[%s1142_s29 + $0x34] sm:$0xf]  ;;  %v864_v35 = vld [vmem:[%s1142_s29 + $0x38] sm:$0xf0]  ;;  %v863_v37 = vor.u32 %v942_v31, %v862_v30  ;;  %v851_v38 = vor.u32 %v937_v32, %v848_v33 }
  0x17   : > { %v867_v39 = vor.u32 %v941_v34, %v864_v35 }
  0x19   : > { %533 = vmatpush.bf16.msra.mxu0 %v947_v6  ;;  %985 = vmatpush.bf16.msra.mxu2 %v947_v6 }
  0x1a   : > { %562 = vmatpush.bf16.msra.mxu1 %v955_v7  ;;  %993 = vmatpush.bf16.msra.mxu3 %v955_v7 }
  0x1d   : > { %534 = vmatpush.bf16.msra.mxu0 %v946_v8  ;;  %986 = vmatpush.bf16.msra.mxu2 %v946_v8 }
  0x1e   : > { %563 = vmatpush.bf16.msra.mxu1 %v954_v9  ;;  %994 = vmatpush.bf16.msra.mxu3 %v954_v9 }
  0x21   : > { %535 = vmatpush.bf16.msra.mxu0 %v945_v10  ;;  %987 = vmatpush.bf16.msra.mxu2 %v945_v10 }
  0x22   : > { %564 = vmatpush.bf16.msra.mxu1 %v953_v11  ;;  %995 = vmatpush.bf16.msra.mxu3 %v953_v11 }
  0x25   : > { %536 = vmatpush.bf16.msra.mxu0 %v944_v12  ;;  %988 = vmatpush.bf16.msra.mxu2 %v944_v12 }
  0x26   : > { %565 = vmatpush.bf16.msra.mxu1 %v952_v13  ;;  %996 = vmatpush.bf16.msra.mxu3 %v952_v13 }
  0x29   : > { %537 = vmatpush.bf16.msra.mxu0 %v943_v14  ;;  %989 = vmatpush.bf16.msra.mxu2 %v943_v14 }
  0x2a   : > { %566 = vmatpush.bf16.msra.mxu1 %v951_v15  ;;  %997 = vmatpush.bf16.msra.mxu3 %v951_v15 }
  0x2c   : > { %538 = vmatmul.bf16.vlgmr.msra.gmra.mxu0 %v839_v24  ;;  %548 = vmatmul.bf16.vlgmr.msra.gmra.mxu2 %v855_v25 }
  0x2d   : > { %567 = vmatmul.bf16.vlgmr.msra.gmra.mxu1 %v843_v26  ;;  %577 = vmatmul.bf16.vlgmr.msra.gmra.mxu3 %v859_v27 }
  0x3c   : > { %543 = vmatmul.bf16.gmra.mxu0 %v847_v36  ;;  %553 = vmatmul.bf16.gmra.mxu2 %v863_v37 }
  0x3d   : > { %572 = vmatmul.bf16.gmra.mxu1 %v851_v38  ;;  %582 = vmatmul.bf16.gmra.mxu3 %v867_v39 }
  0xa9   : > { %v539_v40 = vpop.f32.mrf.mxu0 }
  0xaa   : > { %v568_v41 = vpop.f32.mrf.mxu1 }
  0xab   : > { %v569_v46 = vadd.f32 %v568_v41, %v539_v40 }
  0xad   : > { %v602_v60 = vmul.f32 %v569_v46, %v569_v46 }
  0xaf   : > { %v549_v42 = vpop.f32.mrf.mxu2 }
  0xb0   : > { %v578_v43 = vpop.f32.mrf.mxu3 }
  0xb1   : > { %v541_v44 = vpop.f32.mrf.mxu0  ;;  %v579_v51 = vadd.f32 %v578_v43, %v549_v42 }
  0xb2   : > { %v570_v45 = vpop.f32.mrf.mxu1 }
  0xb3   : > { %v571_v47 = vadd.f32 %v570_v45, %v541_v44  ;;  %v606_v8 = vmul.f32 %v579_v51, %v579_v51 }
  0xb5   : > { %v962_v48 = vpack.c.bf16 %v571_v47, %v569_v46  ;;  %v603_v57 = vmul.f32 %v571_v47, %v571_v47  ;;  %v588_v61 = vadd.f32 %v571_v47, %v569_v46 }
  0xb7   : > { %963 = vst [vmem:[%s1173_s15] sm:$0xff] %v962_v48   ;;  %v551_v49 = vpop.f32.mrf.mxu2  ;;  %v610_v1 = vadd.f32 %v603_v57, %v602_v60 }
  0xb8   : > { %v580_v50 = vpop.f32.mrf.mxu3 }
  0xb9   : > { %v581_v52 = vadd.f32 %v580_v50, %v551_v49  ;;  %v544_v53 = vpop.f32.mrf.mxu0 }
  0xba   : > { %v573_v54 = vpop.f32.mrf.mxu1 }
  0xbb   : > { %v972_v55 = vpack.c.bf16 %v581_v52, %v579_v51  ;;  %v574_v56 = vadd.f32 %v573_v54, %v544_v53  ;;  %v607_v14 = vmul.f32 %v581_v52, %v581_v52 }
  0xbd   : > { %980 = vst [vmem:[%s1173_s15 + $0x10] sm:$0xff] %v972_v55   ;;  %v604_v62 = vmul.f32 %v574_v56, %v574_v56  ;;  %v589_v2 = vadd.f32 %v588_v61, %v574_v56 }
  0xbf   : > { %v554_v58 = vpop.f32.mrf.mxu2  ;;  %v611_v4 = vadd.f32 %v610_v1, %v604_v62 }
  0xc0   : > { %v583_v59 = vpop.f32.mrf.mxu3 }
  0xc1   : > { %v546_v63 = vpop.f32.mrf.mxu0  ;;  %v584_v9 = vadd.f32 %v583_v59, %v554_v58 }
  0xc2   : > { %v575_v0 = vpop.f32.mrf.mxu1 }
  0xc3   : > { %v576_v3 = vadd.f32 %v575_v0, %v546_v63  ;;  %v608_v18 = vmul.f32 %v584_v9, %v584_v9 }
  0xc5   : > { %v590_v5 = vadd.f32 %v589_v2, %v576_v3  ;;  %v605_v6 = vmul.f32 %v576_v3, %v576_v3  ;;  %v967_v7 = vpack.c.bf16 %v576_v3, %v574_v56 }
  0xc7   : > { %v591_v10 = vadd.f32 %v590_v5, %v579_v51  ;;  %v612_v11 = vadd.f32 %v611_v4, %v605_v6  ;;  %979 = vst [vmem:[%s1173_s15 + $0x8] sm:$0xff] %v967_v7   ;;  %v556_v12 = vpop.f32.mrf.mxu2 }
  0xc8   : > { %v585_v13 = vpop.f32.mrf.mxu3 }
  0xc9   : > { %v613_v15 = vadd.f32 %v612_v11, %v606_v8  ;;  %v586_v16 = vadd.f32 %v585_v13, %v556_v12  ;;  %v592_v17 = vadd.f32 %v591_v10, %v581_v52 }
  0xcb   : > { %v593_v19 = vadd.f32 %v592_v17, %v584_v9  ;;  %v614_v20 = vadd.f32 %v613_v15, %v607_v14  ;;  %v977_v21 = vpack.c.bf16 %v586_v16, %v584_v9  ;;  %v609_v23 = vmul.f32 %v586_v16, %v586_v16 }
  0xcd   : > { %v594_v22 = vadd.f32 %v593_v19, %v586_v16  ;;  %v615_v24 = vadd.f32 %v614_v20, %v608_v18  ;;  %981 = vst [vmem:[%s1173_s15 + $0x18] sm:$0xff] %v977_v21  }
  0xcf   : > { %v595_v25 = vrot.slane %v594_v22, 4  ;;  %v616_v26 = vadd.f32 %v615_v24, %v609_v23 }
  0xd1   : > { %v596_v27 = vadd.f32 %v595_v25, %v594_v22  ;;  %v617_v28 = vrot.slane %v616_v26, 4 }
  0xd3   : > { %v597_v29 = vrot.slane %v596_v27, 2  ;;  %v618_v30 = vadd.f32 %v617_v28, %v616_v26 }
  0xd5   : > { %v598_v31 = vadd.f32 %v597_v29, %v596_v27  ;;  %v619_v32 = vrot.slane %v618_v30, 2 }
  0xd7   : > { %v599_v33 = vrot.slane %v598_v31, 1  ;;  %v620_v34 = vadd.f32 %v619_v32, %v618_v30 }
  0xd9   : > { %v600_v35 = vadd.f32 %v599_v33, %v598_v31  ;;  %v621_v36 = vrot.slane %v620_v34, 1 }
  0xdb   : > { %601 = vst [vmem:[%s347_s17] sm:$0x1] %v600_v35  ;;  %v622_v37 = vadd.f32 %v621_v36, %v620_v34 }
  0xdd   : > { %623 = vst [vmem:[%s353_s23] sm:$0x1] %v622_v37 }
  0xde PF: > { %s16_s20 = sadd.s32 1, %s1044_s20   ;;  %s1202_s18 = smov %s1040_s19 }
  0xdf   : > { %p13_p6 = scmp.ge.s32.totalorder %s16_s20, 4   ;;  %s1203_s19 = smov %s1205_s2 }
  0xe1   :  { %15 = sbr.rel (!%p13_p6) target bundleno = 2 (0x2), region = 92 }

// kernel: discriminator_forward.8
= control target key start
LH: loop header
LB: loop body
LE: loop exit
PB: predicated region body
PF: predicated region fallthrough
CT: control target
= control target key end

     0   :  { %s1174_s18 = smov 0   ;;  %s1176_s19 = smov 0   ;;  %s1318_s0 = inlined_call_operand.vmem [shape: bf16[32,512], index: 0, kind: input, shape index: {}]   ;;  %s1319_s1 = inlined_call_operand.vmem [shape: bf16[512,128], index: 1, kind: input, shape index: {}]   ;;  %s1320_s2 = inlined_call_operand.vmem [shape: f32[1,128], index: 2, kind: input, shape index: {}]   ;;  %s1321_s3 = inlined_call_operand.vmem [shape: bf16[32,128], index: 3, kind: output, shape index: {0}]   ;;  %s1322_s4 = inlined_call_operand.vmem [shape: f32[2,1,128], index: 4, kind: output, shape index: {1}]   ;;  %s1323_s5 = inlined_call_operand.vmem [shape: f32[2,1,128], index: 5, kind: output, shape index: {2}]  }
   0x1   :  { %s1178_s20 = smov 0  }
   0x2 LB: > { %s35_s2 = sadd.s32 1, %s1138_s19  ;;  %p902_p0 = scmp.ge.s32.totalorder %s1142_s20, 1  ;;  %s1142_s20 = sphi %s1178_s20, %s16_s20   ;;  %s1138_s19 = sphi %s1176_s19, %s1325_s19   ;;  %s1134_s18 = sphi %s1174_s18, %s1324_s18  }
   0x3   : > { %p37_p1 = scmp.ge.s32.totalorder %s35_s2, 2  ;;  %p250_p2 = scmp.lt.s32.totalorder %s1142_s20, 3 }
   0x5   : > { %s1327_s2 = smov (%p37_p1, %s35_s2), 0  ;;  %p251_p3 = pnand %p902_p0, %p250_p2 }
   0x6   : > { %s903_s23 = sshll.u32 (!%p251_p3), %s1134_s18, 1  ;;  %p342_p5 = scmp.lt.s32.totalorder (!%p251_p3), %s1134_s18, 1 }
   0x7   : > { %254 = sbr.rel (%p251_p3) target bundleno = 207 (0xcf), region = 32  ;;  %p311_p4 = scmp.lt.s32.totalorder (!%p251_p3), %s903_s23, 3 }
   0xc   : > { %v1066_v0 = vld [vmem:[%s1319_s1 + $0x38] sm:$0xff]  ;;  %v1065_v4 = vld [vmem:[%s1319_s1 + $0x30] sm:$0xff]  ;;  %v1064_v8 = vld [vmem:[%s1319_s1 + $0x28] sm:$0xff]  ;;  %s1329_s23 = smov (!%p311_p4, %s903_s23), 3  ;;  %s1331_s18 = smov (!%p342_p5, %s1134_s18), 1 }
   0xd   : > { %v1074_v1 = vld [vmem:[%s1319_s1 + $0x78] sm:$0xff]  ;;  %634 = vmatpush.bf16.msra.mxu0 %v1066_v0  ;;  %v1073_v5 = vld [vmem:[%s1319_s1 + $0x70] sm:$0xff]  ;;  %v1072_v9 = vld [vmem:[%s1319_s1 + $0x68] sm:$0xff]  ;;  %s1054_s27 = sshll.u32 %s1329_s23, 4  ;;  %s907_s26 = sshll.u32 %s1329_s23, 2 }
   0xe   : > { %v1082_v2 = vld [vmem:[%s1319_s1 + $0xb8] sm:$0xff]  ;;  %648 = vmatpush.bf16.msra.mxu1 %v1074_v1  ;;  %v1081_v6 = vld [vmem:[%s1319_s1 + $0xb0] sm:$0xff]  ;;  %v1080_v10 = vld [vmem:[%s1319_s1 + $0xa8] sm:$0xff]  ;;  %s318_s9 = scalar_lea.vmem %s1318_s0, %s1054_s27  ;;  %s340_s29 = scalar_lea.vmem %s1321_s3, %s907_s26 }
   0xf   : > { %v1090_v3 = vld [vmem:[%s1319_s1 + $0xf8] sm:$0xff]  ;;  %662 = vmatpush.bf16.msra.mxu2 %v1082_v2  ;;  %v1089_v7 = vld [vmem:[%s1319_s1 + $0xf0] sm:$0xff]  ;;  %v1088_v11 = vld [vmem:[%s1319_s1 + $0xe8] sm:$0xff]  ;;  %s347_s6 = scalar_lea.vmem %s1322_s4, %s1331_s18 }
  0x10   : > { %676 = vmatpush.bf16.msra.mxu3 %v1090_v3  ;;  %v1063_v12 = vld [vmem:[%s1319_s1 + $0x20] sm:$0xff]  ;;  %v1062_v16 = vld [vmem:[%s1319_s1 + $0x18] sm:$0xff]  ;;  %v1061_v20 = vld [vmem:[%s1319_s1 + $0x10] sm:$0xff] }
  0x11   : > { %635 = vmatpush.bf16.msra.mxu0 %v1065_v4  ;;  %v1071_v13 = vld [vmem:[%s1319_s1 + $0x60] sm:$0xff]  ;;  %v1070_v17 = vld [vmem:[%s1319_s1 + $0x58] sm:$0xff]  ;;  %v1069_v21 = vld [vmem:[%s1319_s1 + $0x50] sm:$0xff] }
  0x12   : > { %649 = vmatpush.bf16.msra.mxu1 %v1073_v5  ;;  %v1079_v14 = vld [vmem:[%s1319_s1 + $0xa0] sm:$0xff]  ;;  %v1078_v18 = vld [vmem:[%s1319_s1 + $0x98] sm:$0xff]  ;;  %v1077_v22 = vld [vmem:[%s1319_s1 + $0x90] sm:$0xff] }
  0x13   : > { %663 = vmatpush.bf16.msra.mxu2 %v1081_v6  ;;  %v1087_v15 = vld [vmem:[%s1319_s1 + $0xe0] sm:$0xff]  ;;  %v1086_v19 = vld [vmem:[%s1319_s1 + $0xd8] sm:$0xff]  ;;  %v1085_v23 = vld [vmem:[%s1319_s1 + $0xd0] sm:$0xff] }
  0x14   : > { %677 = vmatpush.bf16.msra.mxu3 %v1089_v7  ;;  %v1060_v24 = vld [vmem:[%s1319_s1 + $0x8] sm:$0xff]  ;;  %v1059_v28 = vld [vmem:[%s1319_s1] sm:$0xff]  ;;  %v1057_v33 = vld [vmem:[%s318_s9 + $0xc] sm:$0xf0] }
  0x15   : > { %636 = vmatpush.bf16.msra.mxu0 %v1064_v8  ;;  %v1068_v25 = vld [vmem:[%s1319_s1 + $0x48] sm:$0xff]  ;;  %v1067_v29 = vld [vmem:[%s1319_s1 + $0x40] sm:$0xff]  ;;  %v912_v35 = vld [vmem:[%s318_s9 + $0x10] sm:$0xf0] }
  0x16   : > { %650 = vmatpush.bf16.msra.mxu1 %v1072_v9  ;;  %v1076_v26 = vld [vmem:[%s1319_s1 + $0x88] sm:$0xff]  ;;  %v1075_v30 = vld [vmem:[%s1319_s1 + $0x80] sm:$0xff]  ;;  %v1058_v37 = vld [vmem:[%s318_s9 + $0x14] sm:$0xf0] }
  0x17   : > { %664 = vmatpush.bf16.msra.mxu2 %v1080_v10  ;;  %v1084_v27 = vld [vmem:[%s1319_s1 + $0xc8] sm:$0xff]  ;;  %v1083_v31 = vld [vmem:[%s1319_s1 + $0xc0] sm:$0xff]  ;;  %v920_v39 = vld [vmem:[%s318_s9 + $0x18] sm:$0xf0] }
  0x18   : > { %678 = vmatpush.bf16.msra.mxu3 %v1088_v11  ;;  %v910_v32 = vld [vmem:[%s318_s9] sm:$0xf]  ;;  %v1055_v34 = vld [vmem:[%s318_s9 + $0x4] sm:$0xf]  ;;  %v918_v36 = vld [vmem:[%s318_s9 + $0x8] sm:$0xf] }
  0x19   : > { %637 = vmatpush.bf16.msra.mxu0 %v1063_v12  ;;  %v1056_v38 = vld [vmem:[%s318_s9 + $0xc] sm:$0xf]  ;;  %v911_v40 = vor.u32 %v1057_v33, %v910_v32  ;;  %v915_v41 = vor.u32 %v1055_v34, %v912_v35  ;;  %v919_v42 = vor.u32 %v1058_v37, %v918_v36  ;;  %s353_s9 = scalar_lea.vmem %s1323_s5, %s1331_s18 }
  0x1a   : > { %651 = vmatpush.bf16.msra.mxu1 %v1071_v13  ;;  %v923_v43 = vor.u32 %v1056_v38, %v920_v39 }
  0x1b   : > { %665 = vmatpush.bf16.msra.mxu2 %v1079_v14 }
  0x1c   : > { %679 = vmatpush.bf16.msra.mxu3 %v1087_v15 }
  0x1d   : > { %638 = vmatpush.bf16.msra.mxu0 %v1062_v16 }
  0x1e   : > { %652 = vmatpush.bf16.msra.mxu1 %v1070_v17 }
  0x1f   : > { %666 = vmatpush.bf16.msra.mxu2 %v1078_v18 }
  0x20   : > { %680 = vmatpush.bf16.msra.mxu3 %v1086_v19 }
  0x21   : > { %639 = vmatpush.bf16.msra.mxu0 %v1061_v20 }
  0x22   : > { %653 = vmatpush.bf16.msra.mxu1 %v1069_v21 }
  0x23   : > { %667 = vmatpush.bf16.msra.mxu2 %v1077_v22 }
  0x24   : > { %681 = vmatpush.bf16.msra.mxu3 %v1085_v23 }
  0x25   : > { %640 = vmatpush.bf16.msra.mxu0 %v1060_v24 }
  0x26   : > { %654 = vmatpush.bf16.msra.mxu1 %v1068_v25 }
  0x27   : > { %668 = vmatpush.bf16.msra.mxu2 %v1076_v26 }
  0x28   : > { %682 = vmatpush.bf16.msra.mxu3 %v1084_v27 }
  0x29   : > { %641 = vmatpush.bf16.msra.mxu0 %v1059_v28 }
  0x2a   : > { %655 = vmatpush.bf16.msra.mxu1 %v1067_v29 }
  0x2b   : > { %669 = vmatpush.bf16.msra.mxu2 %v1075_v30 }
  0x2c   : > { %683 = vmatpush.bf16.msra.mxu3 %v1083_v31  ;;  %642 = vmatmul.bf16.vlgmr.msra.gmra.mxu0 %v911_v40 }
  0x2d   : > { %656 = vmatmul.bf16.vlgmr.msra.gmra.mxu1 %v915_v41 }
  0x2e   : > { %670 = vmatmul.bf16.vlgmr.msra.gmra.mxu2 %v919_v42 }
  0x2f   : > { %684 = vmatmul.bf16.vlgmr.msra.gmra.mxu3 %v923_v43 }
  0xa9   : > { %v643_v44 = vpop.f32.mrf.mxu0 }
  0xaa   : > { %v657_v45 = vpop.f32.mrf.mxu1 }
  0xab   : > { %v658_v48 = vadd.f32 %v657_v45, %v643_v44 }
  0xb1   : > { %v671_v46 = vpop.f32.mrf.mxu2  ;;  %v645_v49 = vpop.f32.mrf.mxu0 }
  0xb2   : > { %v685_v47 = vpop.f32.mrf.mxu3  ;;  %v659_v50 = vpop.f32.mrf.mxu1  ;;  %v672_v51 = vadd.f32 %v671_v46, %v658_v48 }
  0xb3   : > { %v660_v52 = vadd.f32 %v659_v50, %v645_v49 }
  0xb4   : > { %v686_v54 = vadd.f32 %v685_v47, %v672_v51 }
  0xb6   : > { %v698_v58 = vmul.f32 %v686_v54, %v686_v54 }
  0xb9   : > { %v673_v53 = vpop.f32.mrf.mxu2 }
  0xba   : > { %v674_v55 = vadd.f32 %v673_v53, %v660_v52  ;;  %v687_v56 = vpop.f32.mrf.mxu3 }
  0xbc   : > { %v688_v57 = vadd.f32 %v687_v56, %v674_v55 }
  0xbe   : > { %v690_v59 = vadd.f32 %v688_v57, %v686_v54  ;;  %v699_v60 = vmul.f32 %v688_v57, %v688_v57  ;;  %v1094_v61 = vpack.c.bf16 %v688_v57, %v686_v54 }
  0xc0   : > { %v691_v62 = vrot.slane %v690_v59, 4  ;;  %v700_v63 = vadd.f32 %v699_v60, %v698_v58  ;;  %1095 = vst [vmem:[%s340_s29] sm:$0xff] %v1094_v61  }
  0xc2   : > { %v692_v0 = vadd.f32 %v691_v62, %v690_v59  ;;  %v701_v1 = vrot.slane %v700_v63, 4 }
  0xc4   : > { %v693_v2 = vrot.slane %v692_v0, 2  ;;  %v702_v3 = vadd.f32 %v701_v1, %v700_v63 }
  0xc6   : > { %v694_v4 = vadd.f32 %v693_v2, %v692_v0  ;;  %v703_v5 = vrot.slane %v702_v3, 2 }
  0xc8   : > { %v695_v6 = vrot.slane %v694_v4, 1  ;;  %v704_v7 = vadd.f32 %v703_v5, %v702_v3 }
  0xca   : > { %v696_v8 = vadd.f32 %v695_v6, %v694_v4  ;;  %v705_v9 = vrot.slane %v704_v7, 1 }
  0xcc   : > { %697 = vst [vmem:[%s347_s6] sm:$0x1] %v696_v8  ;;  %v706_v10 = vadd.f32 %v705_v9, %v704_v7 }
  0xce   : > { %707 = vst [vmem:[%s353_s9] sm:$0x1] %v706_v10 }
  0xcf PF: > { %s16_s20 = sadd.s32 1, %s1142_s20   ;;  %s1324_s18 = smov %s1138_s19 }
  0xd0   : > { %p13_p6 = scmp.ge.s32.totalorder %s16_s20, 4   ;;  %s1325_s19 = smov %s1327_s2 }
  0xd2   :  { %15 = sbr.rel (!%p13_p6) target bundleno = 2 (0x2), region = 92 }

// kernel: discriminator_forward.9
= control target key start
LH: loop header
LB: loop body
LE: loop exit
PB: predicated region body
PF: predicated region fallthrough
CT: control target
= control target key end

     0   :  { %s1370_s1 = inlined_call_operand.vmem [shape: bf16[1024,128], index: 1, kind: input, shape index: {}]   ;;  %s1371_s2 = inlined_call_operand.vmem [shape: f32[1,128], index: 2, kind: input, shape index: {}]   ;;  %s1372_s0 = inlined_call_operand.vmem [shape: bf16[16,1024], index: 0, kind: input, shape index: {}]   ;;  %s1373_s3 = inlined_call_operand.vmem [shape: f32[16,128], index: 3, kind: output, shape index: {}]  }
   0x1   :  { %v1035_v0 = vld [vmem:[%s1370_s1 + $0x38] sm:$0xff]  ;;  %v1034_v4 = vld [vmem:[%s1370_s1 + $0x30] sm:$0xff]  ;;  %v1033_v8 = vld [vmem:[%s1370_s1 + $0x28] sm:$0xff] }
   0x2   :  { %v1043_v1 = vld [vmem:[%s1370_s1 + $0x78] sm:$0xff]  ;;  %578 = vmatpush.bf16.msra.mxu0 %v1035_v0  ;;  %v1042_v5 = vld [vmem:[%s1370_s1 + $0x70] sm:$0xff]  ;;  %v1041_v9 = vld [vmem:[%s1370_s1 + $0x68] sm:$0xff] }
   0x3   :  { %v1051_v2 = vld [vmem:[%s1370_s1 + $0xb8] sm:$0xff]  ;;  %592 = vmatpush.bf16.msra.mxu1 %v1043_v1  ;;  %v1050_v6 = vld [vmem:[%s1370_s1 + $0xb0] sm:$0xff]  ;;  %v1049_v10 = vld [vmem:[%s1370_s1 + $0xa8] sm:$0xff] }
   0x4   :  { %v1059_v3 = vld [vmem:[%s1370_s1 + $0xf8] sm:$0xff]  ;;  %606 = vmatpush.bf16.msra.mxu2 %v1051_v2  ;;  %v1058_v7 = vld [vmem:[%s1370_s1 + $0xf0] sm:$0xff]  ;;  %v1057_v11 = vld [vmem:[%s1370_s1 + $0xe8] sm:$0xff] }
   0x5   :  { %620 = vmatpush.bf16.msra.mxu3 %v1059_v3  ;;  %v1032_v12 = vld [vmem:[%s1370_s1 + $0x20] sm:$0xff]  ;;  %v1031_v16 = vld [vmem:[%s1370_s1 + $0x18] sm:$0xff]  ;;  %v1030_v20 = vld [vmem:[%s1370_s1 + $0x10] sm:$0xff] }
   0x6   :  { %579 = vmatpush.bf16.msra.mxu0 %v1034_v4  ;;  %v1040_v13 = vld [vmem:[%s1370_s1 + $0x60] sm:$0xff]  ;;  %v1039_v17 = vld [vmem:[%s1370_s1 + $0x58] sm:$0xff]  ;;  %v1038_v21 = vld [vmem:[%s1370_s1 + $0x50] sm:$0xff] }
   0x7   :  { %593 = vmatpush.bf16.msra.mxu1 %v1042_v5  ;;  %v1048_v14 = vld [vmem:[%s1370_s1 + $0xa0] sm:$0xff]  ;;  %v1047_v18 = vld [vmem:[%s1370_s1 + $0x98] sm:$0xff]  ;;  %v1046_v22 = vld [vmem:[%s1370_s1 + $0x90] sm:$0xff] }
   0x8   :  { %607 = vmatpush.bf16.msra.mxu2 %v1050_v6  ;;  %v1056_v15 = vld [vmem:[%s1370_s1 + $0xe0] sm:$0xff]  ;;  %v1055_v19 = vld [vmem:[%s1370_s1 + $0xd8] sm:$0xff]  ;;  %v1054_v23 = vld [vmem:[%s1370_s1 + $0xd0] sm:$0xff] }
   0x9   :  { %621 = vmatpush.bf16.msra.mxu3 %v1058_v7  ;;  %v1029_v24 = vld [vmem:[%s1370_s1 + $0x8] sm:$0xff]  ;;  %v1028_v28 = vld [vmem:[%s1370_s1] sm:$0xff]  ;;  %v1067_v32 = vld [vmem:[%s1370_s1 + $0x138] sm:$0xff] }
   0xa   :  { %580 = vmatpush.bf16.msra.mxu0 %v1033_v8  ;;  %v1037_v25 = vld [vmem:[%s1370_s1 + $0x48] sm:$0xff]  ;;  %v1036_v29 = vld [vmem:[%s1370_s1 + $0x40] sm:$0xff]  ;;  %v1075_v33 = vld [vmem:[%s1370_s1 + $0x178] sm:$0xff] }
   0xb   :  { %594 = vmatpush.bf16.msra.mxu1 %v1041_v9  ;;  %v1045_v26 = vld [vmem:[%s1370_s1 + $0x88] sm:$0xff]  ;;  %v1044_v30 = vld [vmem:[%s1370_s1 + $0x80] sm:$0xff]  ;;  %v1083_v42 = vld [vmem:[%s1370_s1 + $0x1b8] sm:$0xff] }
   0xc   :  { %608 = vmatpush.bf16.msra.mxu2 %v1049_v10  ;;  %v1053_v27 = vld [vmem:[%s1370_s1 + $0xc8] sm:$0xff]  ;;  %v1052_v31 = vld [vmem:[%s1370_s1 + $0xc0] sm:$0xff]  ;;  %v1091_v43 = vld [vmem:[%s1370_s1 + $0x1f8] sm:$0xff] }
   0xd   :  { %622 = vmatpush.bf16.msra.mxu3 %v1057_v11  ;;  %v742_v34 = vld [vmem:[%s1372_s0 + $0x8] sm:$0xf]  ;;  %v734_v36 = vld [vmem:[%s1372_s0] sm:$0xf]  ;;  %v1021_v38 = vld [vmem:[%s1372_s0 + $0xc] sm:$0xf] }
   0xe   :  { %581 = vmatpush.bf16.msra.mxu0 %v1032_v12  ;;  %v1025_v35 = vld [vmem:[%s1372_s0 + $0x24] sm:$0xf0]  ;;  %v1024_v37 = vld [vmem:[%s1372_s0 + $0x1c] sm:$0xf0]  ;;  %v744_v39 = vld [vmem:[%s1372_s0 + $0x28] sm:$0xf0] }
   0xf   :  { %595 = vmatpush.bf16.msra.mxu1 %v1040_v13  ;;  %v1020_v40 = vld [vmem:[%s1372_s0 + $0x4] sm:$0xf]  ;;  %v743_v44 = vor.u32 %v1025_v35, %v742_v34  ;;  %v735_v45 = vor.u32 %v1024_v37, %v734_v36  ;;  %v747_v46 = vor.u32 %v1021_v38, %v744_v39  ;;  %v1066_v48 = vld [vmem:[%s1370_s1 + $0x130] sm:$0xff]  ;;  %v1065_v52 = vld [vmem:[%s1370_s1 + $0x128] sm:$0xff] }
  0x10   :  { %609 = vmatpush.bf16.msra.mxu2 %v1048_v14  ;;  %v736_v41 = vld [vmem:[%s1372_s0 + $0x20] sm:$0xf0]  ;;  %v1074_v49 = vld [vmem:[%s1370_s1 + $0x170] sm:$0xff]  ;;  %v1073_v53 = vld [vmem:[%s1370_s1 + $0x168] sm:$0xff] }
  0x11   :  { %623 = vmatpush.bf16.msra.mxu3 %v1056_v15  ;;  %v739_v47 = vor.u32 %v1020_v40, %v736_v41  ;;  %v1082_v50 = vld [vmem:[%s1370_s1 + $0x1b0] sm:$0xff]  ;;  %v1081_v54 = vld [vmem:[%s1370_s1 + $0x1a8] sm:$0xff]  ;;  %v1064_v56 = vld [vmem:[%s1370_s1 + $0x120] sm:$0xff] }
  0x12   :  { %582 = vmatpush.bf16.msra.mxu0 %v1031_v16  ;;  %v1090_v51 = vld [vmem:[%s1370_s1 + $0x1f0] sm:$0xff]  ;;  %v1089_v55 = vld [vmem:[%s1370_s1 + $0x1e8] sm:$0xff]  ;;  %v1072_v57 = vld [vmem:[%s1370_s1 + $0x160] sm:$0xff] }
  0x13   :  { %596 = vmatpush.bf16.msra.mxu1 %v1039_v17  ;;  %v1080_v58 = vld [vmem:[%s1370_s1 + $0x1a0] sm:$0xff]  ;;  %v1063_v60 = vld [vmem:[%s1370_s1 + $0x118] sm:$0xff]  ;;  %v1062_v0 = vld [vmem:[%s1370_s1 + $0x110] sm:$0xff] }
  0x14   :  { %610 = vmatpush.bf16.msra.mxu2 %v1047_v18  ;;  %v1088_v59 = vld [vmem:[%s1370_s1 + $0x1e0] sm:$0xff]  ;;  %v1071_v61 = vld [vmem:[%s1370_s1 + $0x158] sm:$0xff]  ;;  %v1070_v1 = vld [vmem:[%s1370_s1 + $0x150] sm:$0xff] }
  0x15   :  { %624 = vmatpush.bf16.msra.mxu3 %v1055_v19  ;;  %v1079_v62 = vld [vmem:[%s1370_s1 + $0x198] sm:$0xff]  ;;  %v1078_v2 = vld [vmem:[%s1370_s1 + $0x190] sm:$0xff]  ;;  %v1061_v4 = vld [vmem:[%s1370_s1 + $0x108] sm:$0xff] }
  0x16   :  { %583 = vmatpush.bf16.msra.mxu0 %v1030_v20  ;;  %v1087_v63 = vld [vmem:[%s1370_s1 + $0x1d8] sm:$0xff]  ;;  %v1086_v3 = vld [vmem:[%s1370_s1 + $0x1d0] sm:$0xff]  ;;  %v1069_v5 = vld [vmem:[%s1370_s1 + $0x148] sm:$0xff] }
  0x17   :  { %597 = vmatpush.bf16.msra.mxu1 %v1038_v21  ;;  %v1077_v6 = vld [vmem:[%s1370_s1 + $0x188] sm:$0xff]  ;;  %v1060_v8 = vld [vmem:[%s1370_s1 + $0x100] sm:$0xff]  ;;  %v750_v12 = vld [vmem:[%s1372_s0 + $0x10] sm:$0xf] }
  0x18   :  { %611 = vmatpush.bf16.msra.mxu2 %v1046_v22  ;;  %v1085_v7 = vld [vmem:[%s1370_s1 + $0x1c8] sm:$0xff]  ;;  %v1068_v9 = vld [vmem:[%s1370_s1 + $0x140] sm:$0xff]  ;;  %v1026_v13 = vld [vmem:[%s1372_s0 + $0x2c] sm:$0xf0] }
  0x19   :  { %625 = vmatpush.bf16.msra.mxu3 %v1054_v23  ;;  %v1076_v10 = vld [vmem:[%s1370_s1 + $0x180] sm:$0xff]  ;;  %v1022_v14 = vld [vmem:[%s1372_s0 + $0x14] sm:$0xf]  ;;  %v758_v16 = vld [vmem:[%s1372_s0 + $0x18] sm:$0xf]  ;;  %v751_v20 = vor.u32 %v1026_v13, %v750_v12 }
  0x1a   :  { %584 = vmatpush.bf16.msra.mxu0 %v1029_v24  ;;  %v1084_v11 = vld [vmem:[%s1370_s1 + $0x1c0] sm:$0xff]  ;;  %v752_v15 = vld [vmem:[%s1372_s0 + $0x30] sm:$0xf0]  ;;  %v1027_v17 = vld [vmem:[%s1372_s0 + $0x34] sm:$0xf0] }
  0x1b   :  { %598 = vmatpush.bf16.msra.mxu1 %v1037_v25  ;;  %v1023_v18 = vld [vmem:[%s1372_s0 + $0x1c] sm:$0xf]  ;;  %v755_v21 = vor.u32 %v1022_v14, %v752_v15  ;;  %v759_v22 = vor.u32 %v1027_v17, %v758_v16  ;;  %v1092_v25 = vld [vmem:[%s1371_s2] ss:$0 sm:$0xff] }
  0x1c   :  { %612 = vmatpush.bf16.msra.mxu2 %v1045_v26  ;;  %v760_v19 = vld [vmem:[%s1372_s0 + $0x38] sm:$0xf0] }
  0x1d   :  { %626 = vmatpush.bf16.msra.mxu3 %v1053_v27  ;;  %v763_v23 = vor.u32 %v1023_v18, %v760_v19 }
  0x1e   :  { %585 = vmatpush.bf16.msra.mxu0 %v1028_v28 }
  0x1f   :  { %599 = vmatpush.bf16.msra.mxu1 %v1036_v29 }
  0x20   :  { %613 = vmatpush.bf16.msra.mxu2 %v1044_v30 }
  0x21   :  { %627 = vmatpush.bf16.msra.mxu3 %v1052_v31  ;;  %586 = vmatmul.bf16.vlgmr.msra.gmra.mxu0 %v735_v45 }
  0x22   :  { %634 = vmatpush.bf16.msrb.mxu0 %v1067_v32  ;;  %600 = vmatmul.bf16.vlgmr.msra.gmra.mxu1 %v739_v47 }
  0x23   :  { %648 = vmatpush.bf16.msrb.mxu1 %v1075_v33  ;;  %614 = vmatmul.bf16.vlgmr.msra.gmra.mxu2 %v743_v44 }
  0x24   :  { %662 = vmatpush.bf16.msrb.mxu2 %v1083_v42  ;;  %628 = vmatmul.bf16.vlgmr.msra.gmra.mxu3 %v747_v46 }
  0x25   :  { %676 = vmatpush.bf16.msrb.mxu3 %v1091_v43 }
  0x26   :  { %635 = vmatpush.bf16.msrb.mxu0 %v1066_v48 }
  0x27   :  { %649 = vmatpush.bf16.msrb.mxu1 %v1074_v49 }
  0x28   :  { %663 = vmatpush.bf16.msrb.mxu2 %v1082_v50 }
  0x29   :  { %677 = vmatpush.bf16.msrb.mxu3 %v1090_v51 }
  0x2a   :  { %636 = vmatpush.bf16.msrb.mxu0 %v1065_v52 }
  0x2b   :  { %650 = vmatpush.bf16.msrb.mxu1 %v1073_v53 }
  0x2c   :  { %664 = vmatpush.bf16.msrb.mxu2 %v1081_v54 }
  0x2d   :  { %678 = vmatpush.bf16.msrb.mxu3 %v1089_v55 }
  0x2e   :  { %637 = vmatpush.bf16.msrb.mxu0 %v1064_v56 }
  0x2f   :  { %651 = vmatpush.bf16.msrb.mxu1 %v1072_v57 }
  0x30   :  { %665 = vmatpush.bf16.msrb.mxu2 %v1080_v58 }
  0x31   :  { %679 = vmatpush.bf16.msrb.mxu3 %v1088_v59 }
  0x32   :  { %638 = vmatpush.bf16.msrb.mxu0 %v1063_v60 }
  0x33   :  { %652 = vmatpush.bf16.msrb.mxu1 %v1071_v61 }
  0x34   :  { %666 = vmatpush.bf16.msrb.mxu2 %v1079_v62 }
  0x35   :  { %680 = vmatpush.bf16.msrb.mxu3 %v1087_v63 }
  0x36   :  { %639 = vmatpush.bf16.msrb.mxu0 %v1062_v0 }
  0x37   :  { %653 = vmatpush.bf16.msrb.mxu1 %v1070_v1 }
  0x38   :  { %667 = vmatpush.bf16.msrb.mxu2 %v1078_v2 }
  0x39   :  { %681 = vmatpush.bf16.msrb.mxu3 %v1086_v3 }
  0x3a   :  { %640 = vmatpush.bf16.msrb.mxu0 %v1061_v4 }
  0x3b   :  { %654 = vmatpush.bf16.msrb.mxu1 %v1069_v5 }
  0x3c   :  { %668 = vmatpush.bf16.msrb.mxu2 %v1077_v6 }
  0x3d   :  { %682 = vmatpush.bf16.msrb.mxu3 %v1085_v7 }
  0x3e   :  { %641 = vmatpush.bf16.msrb.mxu0 %v1060_v8 }
  0x3f   :  { %655 = vmatpush.bf16.msrb.mxu1 %v1068_v9 }
  0x40   :  { %669 = vmatpush.bf16.msrb.mxu2 %v1076_v10 }
  0x41   :  { %683 = vmatpush.bf16.msrb.mxu3 %v1084_v11  ;;  %642 = vmatmul.bf16.vlgmr.msrb.gmra.mxu0 %v751_v20 }
  0x42   :  { %656 = vmatmul.bf16.vlgmr.msrb.gmra.mxu1 %v755_v21 }
  0x43   :  { %670 = vmatmul.bf16.vlgmr.msrb.gmra.mxu2 %v759_v22 }
  0x44   :  { %684 = vmatmul.bf16.vlgmr.msrb.gmra.mxu3 %v763_v23 }
  0x9e   :  { %v587_v24 = vpop.f32.mrf.mxu0 }
  0x9f   :  { %v601_v26 = vpop.f32.mrf.mxu1  ;;  %v588_v27 = vadd.f32 %v1092_v25, %v587_v24 }
  0xa1   :  { %v602_v30 = vadd.f32 %v601_v26, %v588_v27 }
  0xa6   :  { %v615_v28 = vpop.f32.mrf.mxu2  ;;  %v589_v31 = vpop.f32.mrf.mxu0 }
  0xa7   :  { %v629_v29 = vpop.f32.mrf.mxu3  ;;  %v603_v32 = vpop.f32.mrf.mxu1  ;;  %v616_v33 = vadd.f32 %v615_v28, %v602_v30  ;;  %v590_v34 = vadd.f32 %v1092_v25, %v589_v31 }
  0xa9   :  { %v630_v37 = vadd.f32 %v629_v29, %v616_v33  ;;  %v604_v38 = vadd.f32 %v603_v32, %v590_v34 }
  0xae   :  { %v617_v35 = vpop.f32.mrf.mxu2 }
  0xaf   :  { %v631_v36 = vpop.f32.mrf.mxu3  ;;  %v618_v42 = vadd.f32 %v617_v35, %v604_v38 }
  0xb1   :  { %v632_v46 = vadd.f32 %v631_v36, %v618_v42 }
  0xbe   :  { %v643_v39 = vpop.f32.mrf.mxu0 }
  0xbf   :  { %v644_v40 = vadd.f32 %v643_v39, %v630_v37  ;;  %v657_v41 = vpop.f32.mrf.mxu1 }
  0xc1   :  { %v658_v43 = vadd.f32 %v657_v41, %v644_v40 }
  0xc6   :  { %v671_v44 = vpop.f32.mrf.mxu2  ;;  %v645_v48 = vpop.f32.mrf.mxu0 }
  0xc7   :  { %v685_v45 = vpop.f32.mrf.mxu3  ;;  %v672_v47 = vadd.f32 %v671_v44, %v658_v43  ;;  %v646_v50 = vadd.f32 %v645_v48, %v632_v46  ;;  %v659_v52 = vpop.f32.mrf.mxu1 }
  0xc9   :  { %v686_v49 = vadd.f32 %v685_v45, %v672_v47  ;;  %v660_v54 = vadd.f32 %v659_v52, %v646_v50 }
  0xcb   :  { %v690_v51 = vsub.f32 0.0, %v686_v49 }
  0xcd   :  { %v692_v53 = vmul.f32 1.442695, %v690_v51 }
  0xce   :  { %v673_v55 = vpop.f32.mrf.mxu2 }
  0xcf   :  { %1093 = vpow2.f32 %v692_v53  ;;  %v674_v56 = vadd.f32 %v673_v55, %v660_v54  ;;  %v687_v57 = vpop.f32.mrf.mxu3 }
  0xd1   :  { %v688_v58 = vadd.f32 %v687_v57, %v674_v56 }
  0xd3   :  { %v691_v59 = vsub.f32 0.0, %v688_v58 }
  0xd5   :  { %v1094_v60 = vpop.eup %1093  ;;  %v694_v61 = vmul.f32 1.442695, %v691_v59 }
  0xd6   :  { %v696_v62 = vadd.f32 1.0, %v1094_v60 }
  0xd7   :  { %1095 = vpow2.f32 %v694_v61 }
  0xd8   :  { %1097 = vrcp.f32 %v696_v62  ;;  %v709_v4 = vand.u32 2147483648, %v696_v62  ;;  %v707_v6 = vand.u32 2147483647, %v696_v62  ;;  %vm703_vm1 = vweird.f32 %v696_v62 }
  0xda   :  { %v710_v9 = vor.u32 1.1754944e-38, %v709_v4  ;;  %vm708_vm3 = vcmp.eq.f32.partialorder %v707_v6, 8.507059e+37 }
  0xdd   :  { %v1096_v63 = vpop.eup %1095 }
  0xde   :  { %v1098_v0 = vpop.eup %1097  ;;  %v697_v1 = vadd.f32 1.0, %v1096_v63 }
  0xdf   :  { %v699_v2 = vmul.f32 %v1098_v0, %v696_v62  ;;  %vm704_vm0 = vweird.f32 %v1098_v0 }
  0xe0   :  { %1099 = vrcp.f32 %v697_v1  ;;  %vm705_vm2 = vmor %vm703_vm1, %vm704_vm0  ;;  %v723_v14 = vand.u32 2147483648, %v697_v1  ;;  %v721_v16 = vand.u32 2147483647, %v697_v1  ;;  %vm717_vm5 = vweird.f32 %v697_v1 }
  0xe1   :  { %v700_v3 = vsub.f32 1.0, %v699_v2 }
  0xe2   :  { %v724_v18 = vor.u32 1.1754944e-38, %v723_v14  ;;  %vm722_vm7 = vcmp.eq.f32.partialorder %v721_v16, 8.507059e+37 }
  0xe3   :  { %v701_v5 = vmul.f32 %v1098_v0, %v700_v3 }
  0xe5   :  { %v702_v7 = vadd.f32 %v1098_v0, %v701_v5 }
  0xe6   :  { %v1100_v8 = vpop.eup %1099 }
  0xe7   :  { %v706_v10 = vsel %vm705_vm2, %v1098_v0, %v702_v7  ;;  %v713_v11 = vmul.f32 %v1100_v8, %v697_v1  ;;  %vm718_vm4 = vweird.f32 %v1100_v8 }
  0xe8   :  { %v711_v12 = vsel %vm708_vm3, %v710_v9, %v706_v10  ;;  %vm719_vm6 = vmor %vm717_vm5, %vm718_vm4 }
  0xe9   :  { %726 = vst [vmem:[%s1373_s3] sm:$0xff] %v711_v12  ;;  %v714_v13 = vsub.f32 1.0, %v713_v11 }
  0xeb   :  { %v715_v15 = vmul.f32 %v1100_v8, %v714_v13 }
  0xed   :  { %v716_v17 = vadd.f32 %v1100_v8, %v715_v15 }
  0xef   :  { %v720_v19 = vsel %vm719_vm6, %v1100_v8, %v716_v17 }
  0xf0   :  { %v725_v20 = vsel %vm722_vm7, %v724_v18, %v720_v19 }
  0xf1   :  { %727 = vst [vmem:[%s1373_s3 + $0x8] sm:$0xff] %v725_v20 }

</bundles_post_ra>
